<compile_context>
chip_gen: v6e
topology: v6e:2x2x1
jax: 0.10.0
libtpu: 0.0.40
codegen_flags: <defaults>
</compile_context>

<pallas_src>
import functools
import math

import jax
import jax.numpy as jnp
from jax.experimental import pallas as pl
from jax.experimental.pallas import tpu as pltpu

_MASK_VALUE = -1e30  # finite "minus infinity" for additive key-padding masking


def _round_up(x: int, m: int) -> int:
  return ((x + m - 1) // m) * m


def _tile_and_pad(dim: int, preferred: int):
  """Returns (tile, padded_dim). Full-dim block (no pad) when dim <= preferred."""
  if dim <= preferred:
    return dim, dim                      # full-extent block: always legal
  if dim % preferred == 0:
    return preferred, dim                # aligned: no pad copy
  return preferred, _round_up(dim, preferred)


# ---------------------------------------------------------------------------
# Tiled linear (x @ w + b) kernel — bf16 MXU, f32 accumulation
# ---------------------------------------------------------------------------
def _linear_bias_kernel(x_ref, w_ref, b_ref, o_ref, acc_ref):
  k = pl.program_id(2)

  @pl.when(k == 0)
  def _():
    acc_ref[...] = jnp.zeros_like(acc_ref)

  # Cast activations to bf16 in-kernel (f32 inputs are read once from HBM,
  # no separate cast pass).  Weights are pre-cast to bf16 in the wrapper.
  acc_ref[...] += jnp.dot(
      x_ref[...].astype(jnp.bfloat16),
      w_ref[...].astype(jnp.bfloat16),
      preferred_element_type=jnp.float32)

  @pl.when(k == pl.num_programs(2) - 1)
  def _():
    o_ref[...] = (acc_ref[...] + b_ref[...]).astype(o_ref.dtype)


def pallas_linear(x, w, b, out_dtype=jnp.bfloat16):
  """x: (M, K) f32/bf16, w: (K, N) bf16, b: (N,) f32  ->  (M, N) out_dtype."""
  M, K = x.shape
  N = w.shape[1]

  TM, Mp = _tile_and_pad(M, 512)
  TN, Np = _tile_and_pad(N, 256)
  TK, Kp = _tile_and_pad(K, 512)

  # Pad only when the shape is not already tile-aligned.
  if Mp != M or Kp != K:
    x = jnp.zeros((Mp, Kp), x.dtype).at[:M, :K].set(x)
  if Kp != K or Np != N:
    w = jnp.zeros((Kp, Np), w.dtype).at[:K, :N].set(w)
  b2 = b.reshape(1, N).astype(jnp.float32)
  if Np != N:
    b2 = jnp.zeros((1, Np), jnp.float32).at[:, :N].set(b2)

  grid = (Mp // TM, Np // TN, Kp // TK)

  out = pl.pallas_call(
      _linear_bias_kernel,
      out_shape=jax.ShapeDtypeStruct((Mp, Np), out_dtype),
      grid_spec=pltpu.PrefetchScalarGridSpec(
          num_scalar_prefetch=0,
          grid=grid,
          in_specs=[
              pl.BlockSpec((TM, TK), lambda i, j, k: (i, k)),
              pl.BlockSpec((TK, TN), lambda i, j, k: (k, j)),
              pl.BlockSpec((1, TN), lambda i, j, k: (0, j)),
          ],
          out_specs=pl.BlockSpec((TM, TN), lambda i, j, k: (i, j)),
          scratch_shapes=[pltpu.VMEM((TM, TN), jnp.float32)],
      ),
      compiler_params=pltpu.CompilerParams(
          dimension_semantics=("parallel", "parallel", "arbitrary")),
  )(x, w, b2)
  if Mp != M or Np != N:
    out = out[:M, :N]
  return out


# ---------------------------------------------------------------------------
# Flash attention (online softmax), head-packed lane-dense kernel
# ---------------------------------------------------------------------------
def _flash_attn_kernel(q_ref, kv_ref, bias_ref, o_ref, m_sc, l_sc, acc_sc,
                       *, num_heads, head_dim):
  j = pl.program_id(2)
  embed = num_heads * head_dim

  @pl.when(j == 0)
  def _():
    m_sc[...] = jnp.full(m_sc.shape, -jnp.inf, dtype=m_sc.dtype)
    l_sc[...] = jnp.zeros_like(l_sc)
    acc_sc[...] = jnp.zeros_like(acc_sc)

  bias = bias_ref[...]                      # (1, TK) f32 additive key-pad mask

  def _rep(stat128, width):
    # Lane-replicated (TQ, 128) stat -> width lanes.
    if width <= 128:
      return stat128[:, :width]
    return jnp.broadcast_to(stat128[:, :1], (stat128.shape[0], width))

  # Static (unrolled) head loop: Q/KV slabs are already in VMEM for all heads,
  # each head is a static lane slice — no extra HBM traffic, no H grid axis.
  for h in range(num_heads):
    lo, hi = h * head_dim, (h + 1) * head_dim
    q_h = q_ref[:, lo:hi]                   # (TQ, hd) bf16, scale folded in Wq
    k_h = kv_ref[:, lo:hi]                  # (TK, hd) bf16
    v_h = kv_ref[:, embed + lo:embed + hi]  # (TK, hd) bf16

    # QK^T: contract on the lane-resident head_dim (no K transpose).
    s = jax.lax.dot_general(
        q_h, k_h, (((1,), (1,)), ((), ())),
        preferred_element_type=jnp.float32)            # (TQ, TK) f32
    s = s + bias

    m_prev = m_sc[h]                                    # (TQ, 128) lane-repl.
    l_prev = l_sc[h]
    row_max = jnp.max(s, axis=-1, keepdims=True)        # (TQ, 1)
    m_next = jnp.maximum(m_prev, row_max)               # (TQ, 128)
    alpha = jnp.exp(m_prev - m_next)                    # (TQ, 128)
    p = jnp.exp(s - m_next[:, :1])                      # (TQ, TK)
    l_sc[h] = alpha * l_prev + jnp.sum(p, axis=-1, keepdims=True)
    m_sc[h] = m_next

    pv = jax.lax.dot_general(
        p.astype(v_h.dtype), v_h, (((1,), (0,)), ((), ())),
        preferred_element_type=jnp.float32)             # (TQ, hd) f32
    acc_sc[:, lo:hi] = _rep(alpha, head_dim) * acc_sc[:, lo:hi] + pv

  @pl.when(j == pl.num_programs(2) - 1)
  def _():
    inv = jnp.concatenate(
        [_rep(pl.reciprocal(l_sc[h], approx=True), head_dim)
         for h in range(num_heads)], axis=-1)            # (TQ, E)
    o_ref[...] = (acc_sc[...] * inv).astype(o_ref.dtype)  # lane-dense store


def pallas_flash_attention(q, kv, bias, num_heads):
  """q: (B, Lq, E) bf16, kv: (B, Lk, 2E) bf16 ([K|V] cols), bias: (B,1,Lk) f32."""
  B, Lq, E = q.shape
  Lk = kv.shape[1]
  head_dim = E // num_heads

  TQ, Lqp = _tile_and_pad(Lq, 256)
  TK, Lkp = _tile_and_pad(Lk, 256)

  if Lqp != Lq:
    q = jnp.zeros((B, Lqp, E), q.dtype).at[:, :Lq, :].set(q)
  if Lkp != Lk:
    kv = jnp.zeros((B, Lkp, 2 * E), kv.dtype).at[:, :Lk, :].set(kv)
    bias = jnp.full((B, 1, Lkp), _MASK_VALUE, jnp.float32).at[:, :, :Lk].set(bias)

  grid = (B, Lqp // TQ, Lkp // TK)
  kernel = functools.partial(
      _flash_attn_kernel, num_heads=num_heads, head_dim=head_dim)

  out = pl.pallas_call(
      kernel,
      out_shape=jax.ShapeDtypeStruct((B, Lqp, E), jnp.bfloat16),
      grid_spec=pltpu.PrefetchScalarGridSpec(
          num_scalar_prefetch=0,
          grid=grid,
          in_specs=[
              pl.BlockSpec((None, TQ, E), lambda b, i, j: (b, i, 0)),
              pl.BlockSpec((None, TK, 2 * E), lambda b, i, j: (b, j, 0)),
              pl.BlockSpec((None, 1, TK), lambda b, i, j: (b, 0, j)),
          ],
          out_specs=pl.BlockSpec((None, TQ, E), lambda b, i, j: (b, i, 0)),
          scratch_shapes=[
              pltpu.VMEM((num_heads, TQ, 128), jnp.float32),  # running max m
              pltpu.VMEM((num_heads, TQ, 128), jnp.float32),  # running sum l
              pltpu.VMEM((TQ, E), jnp.float32),               # output accum
          ],
      ),
      compiler_params=pltpu.CompilerParams(
          dimension_semantics=("parallel", "parallel", "arbitrary")),
  )(q, kv, bias)
  if Lqp != Lq:
    out = out[:, :Lq, :]
  return out


# ---------------------------------------------------------------------------
# Full GATBlock forward (nn.MultiheadAttention, batch_first=True, eval mode)
# ---------------------------------------------------------------------------
def gat_block_forward(query, key, value, key_padding_mask, params, num_heads):
  in_w = params["in_proj_weight"]     # (3E, E)  rows: [Wq; Wk; Wv]
  in_b = params["in_proj_bias"]       # (3E,)
  out_w = params["out_proj_weight"]   # (E, E)
  out_b = params["out_proj_bias"]     # (E,)

  if value is None:
    value = key

  B, Lq, E = query.shape
  Lk = key.shape[1]
  hd = E // num_heads
  scale = 1.0 / math.sqrt(hd)

  # Fold the softmax scale into the Q projection (no per-tile s*scale in-kernel).
  wq = (in_w[:E] * scale).astype(jnp.float32)
  bq = (in_b[:E] * scale).astype(jnp.float32)
  wkv = in_w[E:].astype(jnp.float32)
  bkv = in_b[E:].astype(jnp.float32)

  q2d = query.reshape(B * Lq, E)

  if (query is key) and (key is value):
    # Full self-attention: one fused QKV projection, x read from HBM once.
    w_all = jnp.concatenate([wq, wkv], axis=0)        # (3E, E)
    b_all = jnp.concatenate([bq, bkv], axis=0)        # (3E,)
    qkv = pallas_linear(q2d, w_all.T.astype(jnp.bfloat16), b_all)   # bf16
    q = qkv[:, :E].reshape(B, Lq, E)
    kv = qkv[:, E:].reshape(B, Lk, 2 * E)
  else:
    q = pallas_linear(q2d, wq.T.astype(jnp.bfloat16), bq).reshape(B, Lq, E)
    if key is value:
      # Fused K/V projection: key activations read once, one kernel launch.
      kv = pallas_linear(key.reshape(B * Lk, E),
                         wkv.T.astype(jnp.bfloat16), bkv).reshape(B, Lk, 2 * E)
    else:
      # TODO(synk): distinct key/value tensors cost an extra concat pass; fuse
      #             via a batched projection kernel if this path becomes hot.
      wk, wv = wkv[:E], wkv[E:]
      bk, bv = bkv[:E], bkv[E:]
      k = pallas_linear(key.reshape(B * Lk, E), wk.T.astype(jnp.bfloat16), bk)
      v = pallas_linear(value.reshape(B * Lk, E), wv.T.astype(jnp.bfloat16), bv)
      kv = jnp.concatenate([k.reshape(B, Lk, E), v.reshape(B, Lk, E)], axis=-1)

  if key_padding_mask is None:
    bias = jnp.zeros((B, 1, Lk), jnp.float32)
  else:
    bias = jnp.where(key_padding_mask[:, None, :], _MASK_VALUE, 0.0)
    bias = bias.astype(jnp.float32)

  attn = pallas_flash_attention(q, kv, bias, num_heads)     # (B, Lq, E) bf16
  out = pallas_linear(attn.reshape(B * Lq, E), out_w.T.astype(jnp.bfloat16),
                      out_b.astype(jnp.float32), out_dtype=jnp.float32)
  return out.reshape(B, Lq, E)


# ---------------------------------------------------------------------------
# Pure-JAX reference (f32) for numerical validation
# ---------------------------------------------------------------------------
def reference_forward(query, key, value, key_padding_mask, params, num_heads):
  in_w, in_b = params["in_proj_weight"], params["in_proj_bias"]
  out_w, out_b = params["out_proj_weight"], params["out_proj_bias"]
  if value is None:
    value = key
  B, Lq, E = query.shape
  Lk = key.shape[1]
  H = num_heads
  hd = E // H

  q = query @ in_w[:E].T + in_b[:E]
  k = key @ in_w[E:2 * E].T + in_b[E:2 * E]
  v = value @ in_w[2 * E:].T + in_b[2 * E:]

  qh = q.reshape(B, Lq, H, hd).transpose(0, 2, 1, 3)
  kh = k.reshape(B, Lk, H, hd).transpose(0, 2, 1, 3)
  vh = v.reshape(B, Lk, H, hd).transpose(0, 2, 1, 3)

  s = jnp.einsum("bhqd,bhkd->bhqk", qh, kh) / math.sqrt(hd)
  if key_padding_mask is not None:
    s = s + jnp.where(key_padding_mask[:, None, None, :], _MASK_VALUE, 0.0)
  p = jax.nn.softmax(s, axis=-1)
  o = jnp.einsum("bhqk,bhkd->bhqd", p, vh)
  o = o.transpose(0, 2, 1, 3).reshape(B, Lq, E)
  return o @ out_w.T + out_b


if __name__ == "__main__":
  B, L, E, H = 2, 8, 32, 4

  root = jax.random.PRNGKey(0)
  kq, kk, kw1, kb1, kw2, kb2 = jax.random.split(root, 6)

  query = jax.random.normal(kq, (B, L, E), jnp.float32)
  key_t = jax.random.normal(kk, (B, L, E), jnp.float32)

  params = dict(
      in_proj_weight=jax.random.normal(kw1, (3 * E, E), jnp.float32)
      / math.sqrt(E),
      in_proj_bias=0.02 * jax.random.normal(kb1, (3 * E,), jnp.float32),
      out_proj_weight=jax.random.normal(kw2, (E, E), jnp.float32)
      / math.sqrt(E),
      out_proj_bias=0.02 * jax.random.normal(kb2, (E,), jnp.float32),
  )

  # key_padding_mask: True = ignore this key (pad last 2 keys of batch 1).
  key_padding_mask = jnp.zeros((B, L), dtype=bool).at[1, -2:].set(True)

  # value=None -> value=key (the module's `value if value is not None else key`
  # usage); this exercises the fused K/V projection path.
  fwd = jax.jit(functools.partial(gat_block_forward, num_heads=H))
  out = fwd(query, key_t, None, key_padding_mask, params)
  out = jax.block_until_ready(out)

  ref = reference_forward(query, key_t, None, key_padding_mask, params, H)
  max_err = float(jnp.max(jnp.abs(out - ref)))
  if not (bool(jnp.all(jnp.isfinite(out))) and max_err < 0.15):
    raise SystemExit(f"numerical mismatch vs reference: max abs err = {max_err}")

  print("KERNEL_OK")
</pallas_src>

<mosaic_0001>
module attributes {stable_mosaic.version = 11 : i64} {
  func.func @_linear_bias_kernel(%arg0: i32, %arg1: i32, %arg2: i32, %arg3: memref<16x32xf32, #tpu.memory_space<vmem>>, %arg4: memref<32x32xbf16, #tpu.memory_space<vmem>>, %arg5: memref<1x32xf32, #tpu.memory_space<vmem>>, %arg6: memref<16x32xbf16, #tpu.memory_space<vmem>>, %arg7: memref<16x32xf32, #tpu.memory_space<vmem>>) attributes {dimension_semantics = [#tpu.dimension_semantics<parallel>, #tpu.dimension_semantics<parallel>, #tpu.dimension_semantics<arbitrary>], iteration_bounds = array<i64: 1, 1, 1>, scalar_prefetch = 0 : i64, scratch_operands = 1 : i64, tpu.core_type = #tpu.core_type<tc>, window_params = [{transform_indices = @transform_0, window_bounds = array<i64: 16, 32>}, {transform_indices = @transform_1, window_bounds = array<i64: 32, 32>}, {transform_indices = @transform_2, window_bounds = array<i64: 1, 32>}, {transform_indices = @transform_3, window_bounds = array<i64: 16, 32>}]} {
    %c0_i32 = arith.constant 0 : i32
    %0 = arith.cmpi eq, %arg2, %c0_i32 : i32
    %1 = arith.extui %0 : i1 to i32
    %c0_i32_0 = arith.constant 0 : i32
    %2 = arith.cmpi ne, %1, %c0_i32_0 : i32
    scf.if %2 {
      %cst_10 = arith.constant 0.000000e+00 : f32
      %13 = vector.broadcast %cst_10 : f32 to vector<16x32xf32>
      %c0_11 = arith.constant 0 : index
      %c0_12 = arith.constant 0 : index
      %14 = vector.load %arg7[%c0_11, %c0_12] : memref<16x32xf32, #tpu.memory_space<vmem>>, vector<16x32xf32>
      tpu.vector_store %arg7[%c0_11, %c0_12], %13 {strides = array<i32>} : memref<16x32xf32, #tpu.memory_space<vmem>>, vector<16x32xf32>,
    } else {
    }
    %c0 = arith.constant 0 : index
    %c0_1 = arith.constant 0 : index
    %3 = vector.load %arg7[%c0, %c0_1] : memref<16x32xf32, #tpu.memory_space<vmem>>, vector<16x32xf32>
    %c0_2 = arith.constant 0 : index
    %c0_3 = arith.constant 0 : index
    %4 = vector.load %arg3[%c0_2, %c0_3] : memref<16x32xf32, #tpu.memory_space<vmem>>, vector<16x32xf32>
    %5 = arith.truncf %4 : vector<16x32xf32> to vector<16x32xbf16>
    %c0_4 = arith.constant 0 : index
    %c0_5 = arith.constant 0 : index
    %6 = vector.load %arg4[%c0_4, %c0_5] : memref<32x32xbf16, #tpu.memory_space<vmem>>, vector<32x32xbf16>
    %cst = arith.constant dense<0.000000e+00> : vector<16x32xf32>
    %7 = tpu.matmul %5, %6, %cst {dimension_numbers = #tpu.dot_dimension_numbers<[1], [0], [0], [1], [0, 0, 1, 1], [], []>} : vector<16x32xbf16>, vector<32x32xbf16>, vector<16x32xf32> -> vector<16x32xf32>
    %8 = arith.addf %3, %7 : vector<16x32xf32>
    %c0_6 = arith.constant 0 : index
    %c0_7 = arith.constant 0 : index
    %9 = vector.load %arg7[%c0_6, %c0_7] : memref<16x32xf32, #tpu.memory_space<vmem>>, vector<16x32xf32>
    tpu.vector_store %arg7[%c0_6, %c0_7], %8 {strides = array<i32>} : memref<16x32xf32, #tpu.memory_space<vmem>>, vector<16x32xf32>,
    %c0_i32_8 = arith.constant 0 : i32
    %10 = arith.cmpi eq, %arg2, %c0_i32_8 : i32
    %11 = arith.extui %10 : i1 to i32
    %c0_i32_9 = arith.constant 0 : i32
    %12 = arith.cmpi ne, %11, %c0_i32_9 : i32
    scf.if %12 {
      %c0_10 = arith.constant 0 : index
      %c0_11 = arith.constant 0 : index
      %13 = vector.load %arg7[%c0_10, %c0_11] : memref<16x32xf32, #tpu.memory_space<vmem>>, vector<16x32xf32>
      %c0_12 = arith.constant 0 : index
      %c0_13 = arith.constant 0 : index
      %14 = vector.load %arg5[%c0_12, %c0_13] : memref<1x32xf32, #tpu.memory_space<vmem>>, vector<1x32xf32>
      %15 = vector.broadcast %14 : vector<1x32xf32> to vector<16x32xf32>
      %16 = arith.addf %13, %15 : vector<16x32xf32>
      %17 = arith.truncf %16 : vector<16x32xf32> to vector<16x32xbf16>
      %c0_14 = arith.constant 0 : index
      %c0_15 = arith.constant 0 : index
      %18 = vector.load %arg6[%c0_14, %c0_15] : memref<16x32xbf16, #tpu.memory_space<vmem>>, vector<16x32xbf16>
      tpu.vector_store %arg6[%c0_14, %c0_15], %17 {strides = array<i32>} : memref<16x32xbf16, #tpu.memory_space<vmem>>, vector<16x32xbf16>,
    } else {
    }
    return
  }
  func.func @transform_0(%arg0: i32, %arg1: i32, %arg2: i32) -> (i32, i32) {
    %c0_i32 = arith.constant 0 : i32
    return %arg0, %arg2 : i32, i32
  }
  func.func @transform_1(%arg0: i32, %arg1: i32, %arg2: i32) -> (i32, i32) {
    %c0_i32 = arith.constant 0 : i32
    return %arg2, %arg1 : i32, i32
  }
  func.func @transform_2(%arg0: i32, %arg1: i32, %arg2: i32) -> (i32, i32) {
    %c0_i32 = arith.constant 0 : i32
    %c0_i32_0 = arith.constant 0 : i32
    return %c0_i32, %arg1 : i32, i32
  }
  func.func @transform_3(%arg0: i32, %arg1: i32, %arg2: i32) -> (i32, i32) {
    %c0_i32 = arith.constant 0 : i32
    return %arg0, %arg1 : i32, i32
  }
}

module attributes {stable_mosaic.version = 11 : i64} {
  func.func @_linear_bias_kernel(%arg0: i32, %arg1: i32, %arg2: i32, %arg3: memref<16x32xf32, #tpu.memory_space<vmem>>, %arg4: memref<32x64xbf16, #tpu.memory_space<vmem>>, %arg5: memref<1x64xf32, #tpu.memory_space<vmem>>, %arg6: memref<16x64xbf16, #tpu.memory_space<vmem>>, %arg7: memref<16x64xf32, #tpu.memory_space<vmem>>) attributes {dimension_semantics = [#tpu.dimension_semantics<parallel>, #tpu.dimension_semantics<parallel>, #tpu.dimension_semantics<arbitrary>], iteration_bounds = array<i64: 1, 1, 1>, scalar_prefetch = 0 : i64, scratch_operands = 1 : i64, tpu.core_type = #tpu.core_type<tc>, window_params = [{transform_indices = @transform_0, window_bounds = array<i64: 16, 32>}, {transform_indices = @transform_1, window_bounds = array<i64: 32, 64>}, {transform_indices = @transform_2, window_bounds = array<i64: 1, 64>}, {transform_indices = @transform_3, window_bounds = array<i64: 16, 64>}]} {
    %c0_i32 = arith.constant 0 : i32
    %0 = arith.cmpi eq, %arg2, %c0_i32 : i32
    %1 = arith.extui %0 : i1 to i32
    %c0_i32_0 = arith.constant 0 : i32
    %2 = arith.cmpi ne, %1, %c0_i32_0 : i32
    scf.if %2 {
      %cst_10 = arith.constant 0.000000e+00 : f32
      %13 = vector.broadcast %cst_10 : f32 to vector<16x64xf32>
      %c0_11 = arith.constant 0 : index
      %c0_12 = arith.constant 0 : index
      %14 = vector.load %arg7[%c0_11, %c0_12] : memref<16x64xf32, #tpu.memory_space<vmem>>, vector<16x64xf32>
      tpu.vector_store %arg7[%c0_11, %c0_12], %13 {strides = array<i32>} : memref<16x64xf32, #tpu.memory_space<vmem>>, vector<16x64xf32>,
    } else {
    }
    %c0 = arith.constant 0 : index
    %c0_1 = arith.constant 0 : index
    %3 = vector.load %arg7[%c0, %c0_1] : memref<16x64xf32, #tpu.memory_space<vmem>>, vector<16x64xf32>
    %c0_2 = arith.constant 0 : index
    %c0_3 = arith.constant 0 : index
    %4 = vector.load %arg3[%c0_2, %c0_3] : memref<16x32xf32, #tpu.memory_space<vmem>>, vector<16x32xf32>
    %5 = arith.truncf %4 : vector<16x32xf32> to vector<16x32xbf16>
    %c0_4 = arith.constant 0 : index
    %c0_5 = arith.constant 0 : index
    %6 = vector.load %arg4[%c0_4, %c0_5] : memref<32x64xbf16, #tpu.memory_space<vmem>>, vector<32x64xbf16>
    %cst = arith.constant dense<0.000000e+00> : vector<16x64xf32>
    %7 = tpu.matmul %5, %6, %cst {dimension_numbers = #tpu.dot_dimension_numbers<[1], [0], [0], [1], [0, 0, 1, 1], [], []>} : vector<16x32xbf16>, vector<32x64xbf16>, vector<16x64xf32> -> vector<16x64xf32>
    %8 = arith.addf %3, %7 : vector<16x64xf32>
    %c0_6 = arith.constant 0 : index
    %c0_7 = arith.constant 0 : index
    %9 = vector.load %arg7[%c0_6, %c0_7] : memref<16x64xf32, #tpu.memory_space<vmem>>, vector<16x64xf32>
    tpu.vector_store %arg7[%c0_6, %c0_7], %8 {strides = array<i32>} : memref<16x64xf32, #tpu.memory_space<vmem>>, vector<16x64xf32>,
    %c0_i32_8 = arith.constant 0 : i32
    %10 = arith.cmpi eq, %arg2, %c0_i32_8 : i32
    %11 = arith.extui %10 : i1 to i32
    %c0_i32_9 = arith.constant 0 : i32
    %12 = arith.cmpi ne, %11, %c0_i32_9 : i32
    scf.if %12 {
      %c0_10 = arith.constant 0 : index
      %c0_11 = arith.constant 0 : index
      %13 = vector.load %arg7[%c0_10, %c0_11] : memref<16x64xf32, #tpu.memory_space<vmem>>, vector<16x64xf32>
      %c0_12 = arith.constant 0 : index
      %c0_13 = arith.constant 0 : index
      %14 = vector.load %arg5[%c0_12, %c0_13] : memref<1x64xf32, #tpu.memory_space<vmem>>, vector<1x64xf32>
      %15 = vector.broadcast %14 : vector<1x64xf32> to vector<16x64xf32>
      %16 = arith.addf %13, %15 : vector<16x64xf32>
      %17 = arith.truncf %16 : vector<16x64xf32> to vector<16x64xbf16>
      %c0_14 = arith.constant 0 : index
      %c0_15 = arith.constant 0 : index
      %18 = vector.load %arg6[%c0_14, %c0_15] : memref<16x64xbf16, #tpu.memory_space<vmem>>, vector<16x64xbf16>
      tpu.vector_store %arg6[%c0_14, %c0_15], %17 {strides = array<i32>} : memref<16x64xbf16, #tpu.memory_space<vmem>>, vector<16x64xbf16>,
    } else {
    }
    return
  }
  func.func @transform_0(%arg0: i32, %arg1: i32, %arg2: i32) -> (i32, i32) {
    %c0_i32 = arith.constant 0 : i32
    return %arg0, %arg2 : i32, i32
  }
  func.func @transform_1(%arg0: i32, %arg1: i32, %arg2: i32) -> (i32, i32) {
    %c0_i32 = arith.constant 0 : i32
    return %arg2, %arg1 : i32, i32
  }
  func.func @transform_2(%arg0: i32, %arg1: i32, %arg2: i32) -> (i32, i32) {
    %c0_i32 = arith.constant 0 : i32
    %c0_i32_0 = arith.constant 0 : i32
    return %c0_i32, %arg1 : i32, i32
  }
  func.func @transform_3(%arg0: i32, %arg1: i32, %arg2: i32) -> (i32, i32) {
    %c0_i32 = arith.constant 0 : i32
    return %arg0, %arg1 : i32, i32
  }
}

module attributes {stable_mosaic.version = 11 : i64} {
  func.func @_flash_attn_kernel(%arg0: i32, %arg1: i32, %arg2: i32, %arg3: memref<1x8x32xbf16, #tpu.memory_space<vmem>>, %arg4: memref<1x8x64xbf16, #tpu.memory_space<vmem>>, %arg5: memref<1x1x8xf32, #tpu.memory_space<vmem>>, %arg6: memref<1x8x32xbf16, #tpu.memory_space<vmem>>, %arg7: memref<4x8x128xf32, #tpu.memory_space<vmem>>, %arg8: memref<4x8x128xf32, #tpu.memory_space<vmem>>, %arg9: memref<8x32xf32, #tpu.memory_space<vmem>>) attributes {dimension_semantics = [#tpu.dimension_semantics<parallel>, #tpu.dimension_semantics<parallel>, #tpu.dimension_semantics<arbitrary>], iteration_bounds = array<i64: 2, 1, 1>, scalar_prefetch = 0 : i64, scratch_operands = 3 : i64, tpu.core_type = #tpu.core_type<tc>, window_params = [{transform_indices = @transform_0, window_bounds = array<i64: 1, 8, 32>}, {transform_indices = @transform_1, window_bounds = array<i64: 1, 8, 64>}, {transform_indices = @transform_2, window_bounds = array<i64: 1, 1, 8>}, {transform_indices = @transform_3, window_bounds = array<i64: 1, 8, 32>}]} {
    %c0_i32 = arith.constant 0 : i32
    %0 = arith.cmpi eq, %arg2, %c0_i32 : i32
    %1 = arith.extui %0 : i1 to i32
    %c0_i32_0 = arith.constant 0 : i32
    %2 = arith.cmpi ne, %1, %c0_i32_0 : i32
    scf.if %2 {
      %cst_110 = arith.constant 0xFF800000 : f32
      %172 = vector.broadcast %cst_110 : f32 to vector<4x8x128xf32>
      %c0_111 = arith.constant 0 : index
      %c0_112 = arith.constant 0 : index
      %c0_113 = arith.constant 0 : index
      %173 = vector.load %arg7[%c0_111, %c0_112, %c0_113] : memref<4x8x128xf32, #tpu.memory_space<vmem>>, vector<4x8x128xf32>
      tpu.vector_store %arg7[%c0_111, %c0_112, %c0_113], %172 {strides = array<i32>} : memref<4x8x128xf32, #tpu.memory_space<vmem>>, vector<4x8x128xf32>,
      %cst_114 = arith.constant 0.000000e+00 : f32
      %174 = vector.broadcast %cst_114 : f32 to vector<4x8x128xf32>
      %c0_115 = arith.constant 0 : index
      %c0_116 = arith.constant 0 : index
      %c0_117 = arith.constant 0 : index
      %175 = vector.load %arg8[%c0_115, %c0_116, %c0_117] : memref<4x8x128xf32, #tpu.memory_space<vmem>>, vector<4x8x128xf32>
      tpu.vector_store %arg8[%c0_115, %c0_116, %c0_117], %174 {strides = array<i32>} : memref<4x8x128xf32, #tpu.memory_space<vmem>>, vector<4x8x128xf32>,
      %cst_118 = arith.constant 0.000000e+00 : f32
      %176 = vector.broadcast %cst_118 : f32 to vector<8x32xf32>
      %c0_119 = arith.constant 0 : index
      %c0_120 = arith.constant 0 : index
      %177 = vector.load %arg9[%c0_119, %c0_120] : memref<8x32xf32, #tpu.memory_space<vmem>>, vector<8x32xf32>
      tpu.vector_store %arg9[%c0_119, %c0_120], %176 {strides = array<i32>} : memref<8x32xf32, #tpu.memory_space<vmem>>, vector<8x32xf32>,
    } else {
    }
    %c0 = arith.constant 0 : index
    %c0_1 = arith.constant 0 : index
    %c0_2 = arith.constant 0 : index
    %3 = vector.load %arg5[%c0, %c0_1, %c0_2] : memref<1x1x8xf32, #tpu.memory_space<vmem>>, vector<1x1x8xf32>
    %4 = vector.shape_cast %3 : vector<1x1x8xf32> to vector<1x8xf32>
    %c0_3 = arith.constant 0 : index
    %c0_4 = arith.constant 0 : index
    %c0_5 = arith.constant 0 : index
    %5 = vector.load %arg3[%c0_3, %c0_4, %c0_5] : memref<1x8x32xbf16, #tpu.memory_space<vmem>>, vector<1x8x8xbf16>
    %6 = vector.shape_cast %5 : vector<1x8x8xbf16> to vector<8x8xbf16>
    %c0_6 = arith.constant 0 : index
    %c0_7 = arith.constant 0 : index
    %c0_8 = arith.constant 0 : index
    %7 = vector.load %arg4[%c0_6, %c0_7, %c0_8] : memref<1x8x64xbf16, #tpu.memory_space<vmem>>, vector<1x8x8xbf16>
    %8 = vector.shape_cast %7 : vector<1x8x8xbf16> to vector<8x8xbf16>
    %c0_9 = arith.constant 0 : index
    %c0_10 = arith.constant 0 : index
    %c32 = arith.constant 32 : index
    %9 = vector.load %arg4[%c0_9, %c0_10, %c32] : memref<1x8x64xbf16, #tpu.memory_space<vmem>>, vector<1x8x8xbf16>
    %10 = vector.shape_cast %9 : vector<1x8x8xbf16> to vector<8x8xbf16>
    %cst = arith.constant dense<0.000000e+00> : vector<8x8xf32>
    %11 = tpu.matmul %6, %8, %cst {dimension_numbers = #tpu.dot_dimension_numbers<[1], [1], [0], [0], [0, 0, 1, 0], [], []>} : vector<8x8xbf16>, vector<8x8xbf16>, vector<8x8xf32> -> vector<8x8xf32>
    %12 = vector.broadcast %4 : vector<1x8xf32> to vector<8x8xf32>
    %13 = arith.addf %11, %12 : vector<8x8xf32>
    %c0_11 = arith.constant 0 : index
    %c0_12 = arith.constant 0 : index
    %c0_13 = arith.constant 0 : index
    %14 = vector.load %arg7[%c0_11, %c0_12, %c0_13] : memref<4x8x128xf32, #tpu.memory_space<vmem>>, vector<1x8x128xf32>
    %15 = vector.shape_cast %14 : vector<1x8x128xf32> to vector<8x128xf32>
    %c0_14 = arith.constant 0 : index
    %c0_15 = arith.constant 0 : index
    %c0_16 = arith.constant 0 : index
    %16 = vector.load %arg8[%c0_14, %c0_15, %c0_16] : memref<4x8x128xf32, #tpu.memory_space<vmem>>, vector<1x8x128xf32>
    %17 = vector.shape_cast %16 : vector<1x8x128xf32> to vector<8x128xf32>
    %cst_17 = arith.constant dense<0xFF800000> : vector<8xf32>
    %18 = vector.multi_reduction <maximumf>, %13, %cst_17 [1] : vector<8x8xf32> to vector<8xf32>
    %19 = vector.shape_cast %18 : vector<8xf32> to vector<8x1xf32>
    %20 = vector.broadcast %19 : vector<8x1xf32> to vector<8x128xf32>
    %21 = arith.maximumf %15, %20 : vector<8x128xf32>
    %22 = arith.subf %15, %21 : vector<8x128xf32>
    %23 = math.exp %22 : vector<8x128xf32>
    %24 = vector.extract_strided_slice %21 {offsets = [0, 0], sizes = [8, 1], strides = [1, 1]} : vector<8x128xf32> to vector<8x1xf32>
    %25 = vector.broadcast %24 : vector<8x1xf32> to vector<8x8xf32>
    %26 = arith.subf %13, %25 : vector<8x8xf32>
    %27 = math.exp %26 : vector<8x8xf32>
    %28 = arith.mulf %23, %17 : vector<8x128xf32>
    %cst_18 = arith.constant dense<0.000000e+00> : vector<8xf32>
    %29 = vector.multi_reduction <add>, %27, %cst_18 [1] : vector<8x8xf32> to vector<8xf32>
    %30 = vector.shape_cast %29 : vector<8xf32> to vector<8x1xf32>
    %31 = vector.broadcast %30 : vector<8x1xf32> to vector<8x128xf32>
    %32 = arith.addf %28, %31 : vector<8x128xf32>
    %c0_19 = arith.constant 0 : index
    %c0_20 = arith.constant 0 : index
    %c0_21 = arith.constant 0 : index
    %33 = vector.load %arg8[%c0_19, %c0_20, %c0_21] : memref<4x8x128xf32, #tpu.memory_space<vmem>>, vector<1x8x128xf32>
    %34 = vector.shape_cast %33 : vector<1x8x128xf32> to vector<8x128xf32>
    %35 = vector.shape_cast %32 : vector<8x128xf32> to vector<1x8x128xf32>
    tpu.vector_store %arg8[%c0_19, %c0_20, %c0_21], %35 {strides = array<i32>} : memref<4x8x128xf32, #tpu.memory_space<vmem>>, vector<1x8x128xf32>,
    %c0_22 = arith.constant 0 : index
    %c0_23 = arith.constant 0 : index
    %c0_24 = arith.constant 0 : index
    %36 = vector.load %arg7[%c0_22, %c0_23, %c0_24] : memref<4x8x128xf32, #tpu.memory_space<vmem>>, vector<1x8x128xf32>
    %37 = vector.shape_cast %36 : vector<1x8x128xf32> to vector<8x128xf32>
    %38 = vector.shape_cast %21 : vector<8x128xf32> to vector<1x8x128xf32>
    tpu.vector_store %arg7[%c0_22, %c0_23, %c0_24], %38 {strides = array<i32>} : memref<4x8x128xf32, #tpu.memory_space<vmem>>, vector<1x8x128xf32>,
    %39 = arith.truncf %27 : vector<8x8xf32> to vector<8x8xbf16>
    %cst_25 = arith.constant dense<0.000000e+00> : vector<8x8xf32>
    %40 = tpu.matmul %39, %10, %cst_25 {dimension_numbers = #tpu.dot_dimension_numbers<[1], [0], [0], [1], [0, 0, 1, 1], [], []>} : vector<8x8xbf16>, vector<8x8xbf16>, vector<8x8xf32> -> vector<8x8xf32>
    %41 = vector.extract_strided_slice %23 {offsets = [0, 0], sizes = [8, 8], strides = [1, 1]} : vector<8x128xf32> to vector<8x8xf32>
    %c0_26 = arith.constant 0 : index
    %c0_27 = arith.constant 0 : index
    %42 = vector.load %arg9[%c0_26, %c0_27] : memref<8x32xf32, #tpu.memory_space<vmem>>, vector<8x8xf32>
    %43 = arith.mulf %41, %42 : vector<8x8xf32>
    %44 = arith.addf %43, %40 : vector<8x8xf32>
    %c0_28 = arith.constant 0 : index
    %c0_29 = arith.constant 0 : index
    %45 = vector.load %arg9[%c0_28, %c0_29] : memref<8x32xf32, #tpu.memory_space<vmem>>, vector<8x8xf32>
    tpu.vector_store %arg9[%c0_28, %c0_29], %44 {strides = array<i32>} : memref<8x32xf32, #tpu.memory_space<vmem>>, vector<8x8xf32>,
    %c0_30 = arith.constant 0 : index
    %c0_31 = arith.constant 0 : index
    %c8 = arith.constant 8 : index
    %46 = vector.load %arg3[%c0_30, %c0_31, %c8] : memref<1x8x32xbf16, #tpu.memory_space<vmem>>, vector<1x8x8xbf16>
    %47 = vector.shape_cast %46 : vector<1x8x8xbf16> to vector<8x8xbf16>
    %c0_32 = arith.constant 0 : index
    %c0_33 = arith.constant 0 : index
    %c8_34 = arith.constant 8 : index
    %48 = vector.load %arg4[%c0_32, %c0_33, %c8_34] : memref<1x8x64xbf16, #tpu.memory_space<vmem>>, vector<1x8x8xbf16>
    %49 = vector.shape_cast %48 : vector<1x8x8xbf16> to vector<8x8xbf16>
    %c0_35 = arith.constant 0 : index
    %c0_36 = arith.constant 0 : index
    %c40 = arith.constant 40 : index
    %50 = vector.load %arg4[%c0_35, %c0_36, %c40] : memref<1x8x64xbf16, #tpu.memory_space<vmem>>, vector<1x8x8xbf16>
    %51 = vector.shape_cast %50 : vector<1x8x8xbf16> to vector<8x8xbf16>
    %cst_37 = arith.constant dense<0.000000e+00> : vector<8x8xf32>
    %52 = tpu.matmul %47, %49, %cst_37 {dimension_numbers = #tpu.dot_dimension_numbers<[1], [1], [0], [0], [0, 0, 1, 0], [], []>} : vector<8x8xbf16>, vector<8x8xbf16>, vector<8x8xf32> -> vector<8x8xf32>
    %53 = vector.broadcast %4 : vector<1x8xf32> to vector<8x8xf32>
    %54 = arith.addf %52, %53 : vector<8x8xf32>
    %c1 = arith.constant 1 : index
    %c0_38 = arith.constant 0 : index
    %c0_39 = arith.constant 0 : index
    %55 = vector.load %arg7[%c1, %c0_38, %c0_39] : memref<4x8x128xf32, #tpu.memory_space<vmem>>, vector<1x8x128xf32>
    %56 = vector.shape_cast %55 : vector<1x8x128xf32> to vector<8x128xf32>
    %c1_40 = arith.constant 1 : index
    %c0_41 = arith.constant 0 : index
    %c0_42 = arith.constant 0 : index
    %57 = vector.load %arg8[%c1_40, %c0_41, %c0_42] : memref<4x8x128xf32, #tpu.memory_space<vmem>>, vector<1x8x128xf32>
    %58 = vector.shape_cast %57 : vector<1x8x128xf32> to vector<8x128xf32>
    %cst_43 = arith.constant dense<0xFF800000> : vector<8xf32>
    %59 = vector.multi_reduction <maximumf>, %54, %cst_43 [1] : vector<8x8xf32> to vector<8xf32>
    %60 = vector.shape_cast %59 : vector<8xf32> to vector<8x1xf32>
    %61 = vector.broadcast %60 : vector<8x1xf32> to vector<8x128xf32>
    %62 = arith.maximumf %56, %61 : vector<8x128xf32>
    %63 = arith.subf %56, %62 : vector<8x128xf32>
    %64 = math.exp %63 : vector<8x128xf32>
    %65 = vector.extract_strided_slice %62 {offsets = [0, 0], sizes = [8, 1], strides = [1, 1]} : vector<8x128xf32> to vector<8x1xf32>
    %66 = vector.broadcast %65 : vector<8x1xf32> to vector<8x8xf32>
    %67 = arith.subf %54, %66 : vector<8x8xf32>
    %68 = math.exp %67 : vector<8x8xf32>
    %69 = arith.mulf %64, %58 : vector<8x128xf32>
    %cst_44 = arith.constant dense<0.000000e+00> : vector<8xf32>
    %70 = vector.multi_reduction <add>, %68, %cst_44 [1] : vector<8x8xf32> to vector<8xf32>
    %71 = vector.shape_cast %70 : vector<8xf32> to vector<8x1xf32>
    %72 = vector.broadcast %71 : vector<8x1xf32> to vector<8x128xf32>
    %73 = arith.addf %69, %72 : vector<8x128xf32>
    %c1_45 = arith.constant 1 : index
    %c0_46 = arith.constant 0 : index
    %c0_47 = arith.constant 0 : index
    %74 = vector.load %arg8[%c1_45, %c0_46, %c0_47] : memref<4x8x128xf32, #tpu.memory_space<vmem>>, vector<1x8x128xf32>
    %75 = vector.shape_cast %74 : vector<1x8x128xf32> to vector<8x128xf32>
    %76 = vector.shape_cast %73 : vector<8x128xf32> to vector<1x8x128xf32>
    tpu.vector_store %arg8[%c1_45, %c0_46, %c0_47], %76 {strides = array<i32>} : memref<4x8x128xf32, #tpu.memory_space<vmem>>, vector<1x8x128xf32>,
    %c1_48 = arith.constant 1 : index
    %c0_49 = arith.constant 0 : index
    %c0_50 = arith.constant 0 : index
    %77 = vector.load %arg7[%c1_48, %c0_49, %c0_50] : memref<4x8x128xf32, #tpu.memory_space<vmem>>, vector<1x8x128xf32>
    %78 = vector.shape_cast %77 : vector<1x8x128xf32> to vector<8x128xf32>
    %79 = vector.shape_cast %62 : vector<8x128xf32> to vector<1x8x128xf32>
    tpu.vector_store %arg7[%c1_48, %c0_49, %c0_50], %79 {strides = array<i32>} : memref<4x8x128xf32, #tpu.memory_space<vmem>>, vector<1x8x128xf32>,
    %80 = arith.truncf %68 : vector<8x8xf32> to vector<8x8xbf16>
    %cst_51 = arith.constant dense<0.000000e+00> : vector<8x8xf32>
    %81 = tpu.matmul %80, %51, %cst_51 {dimension_numbers = #tpu.dot_dimension_numbers<[1], [0], [0], [1], [0, 0, 1, 1], [], []>} : vector<8x8xbf16>, vector<8x8xbf16>, vector<8x8xf32> -> vector<8x8xf32>
    %82 = vector.extract_strided_slice %64 {offsets = [0, 0], sizes = [8, 8], strides = [1, 1]} : vector<8x128xf32> to vector<8x8xf32>
    %c0_52 = arith.constant 0 : index
    %c8_53 = arith.constant 8 : index
    %83 = vector.load %arg9[%c0_52, %c8_53] : memref<8x32xf32, #tpu.memory_space<vmem>>, vector<8x8xf32>
    %84 = arith.mulf %82, %83 : vector<8x8xf32>
    %85 = arith.addf %84, %81 : vector<8x8xf32>
    %c0_54 = arith.constant 0 : index
    %c8_55 = arith.constant 8 : index
    %86 = vector.load %arg9[%c0_54, %c8_55] : memref<8x32xf32, #tpu.memory_space<vmem>>, vector<8x8xf32>
    tpu.vector_store %arg9[%c0_54, %c8_55], %85 {strides = array<i32>} : memref<8x32xf32, #tpu.memory_space<vmem>>, vector<8x8xf32>,
    %c0_56 = arith.constant 0 : index
    %c0_57 = arith.constant 0 : index
    %c16 = arith.constant 16 : index
    %87 = vector.load %arg3[%c0_56, %c0_57, %c16] : memref<1x8x32xbf16, #tpu.memory_space<vmem>>, vector<1x8x8xbf16>
    %88 = vector.shape_cast %87 : vector<1x8x8xbf16> to vector<8x8xbf16>
    %c0_58 = arith.constant 0 : index
    %c0_59 = arith.constant 0 : index
    %c16_60 = arith.constant 16 : index
    %89 = vector.load %arg4[%c0_58, %c0_59, %c16_60] : memref<1x8x64xbf16, #tpu.memory_space<vmem>>, vector<1x8x8xbf16>
    %90 = vector.shape_cast %89 : vector<1x8x8xbf16> to vector<8x8xbf16>
    %c0_61 = arith.constant 0 : index
    %c0_62 = arith.constant 0 : index
    %c48 = arith.constant 48 : index
    %91 = vector.load %arg4[%c0_61, %c0_62, %c48] : memref<1x8x64xbf16, #tpu.memory_space<vmem>>, vector<1x8x8xbf16>
    %92 = vector.shape_cast %91 : vector<1x8x8xbf16> to vector<8x8xbf16>
    %cst_63 = arith.constant dense<0.000000e+00> : vector<8x8xf32>
    %93 = tpu.matmul %88, %90, %cst_63 {dimension_numbers = #tpu.dot_dimension_numbers<[1], [1], [0], [0], [0, 0, 1, 0], [], []>} : vector<8x8xbf16>, vector<8x8xbf16>, vector<8x8xf32> -> vector<8x8xf32>
    %94 = vector.broadcast %4 : vector<1x8xf32> to vector<8x8xf32>
    %95 = arith.addf %93, %94 : vector<8x8xf32>
    %c2 = arith.constant 2 : index
    %c0_64 = arith.constant 0 : index
    %c0_65 = arith.constant 0 : index
    %96 = vector.load %arg7[%c2, %c0_64, %c0_65] : memref<4x8x128xf32, #tpu.memory_space<vmem>>, vector<1x8x128xf32>
    %97 = vector.shape_cast %96 : vector<1x8x128xf32> to vector<8x128xf32>
    %c2_66 = arith.constant 2 : index
    %c0_67 = arith.constant 0 : index
    %c0_68 = arith.constant 0 : index
    %98 = vector.load %arg8[%c2_66, %c0_67, %c0_68] : memref<4x8x128xf32, #tpu.memory_space<vmem>>, vector<1x8x128xf32>
    %99 = vector.shape_cast %98 : vector<1x8x128xf32> to vector<8x128xf32>
    %cst_69 = arith.constant dense<0xFF800000> : vector<8xf32>
    %100 = vector.multi_reduction <maximumf>, %95, %cst_69 [1] : vector<8x8xf32> to vector<8xf32>
    %101 = vector.shape_cast %100 : vector<8xf32> to vector<8x1xf32>
    %102 = vector.broadcast %101 : vector<8x1xf32> to vector<8x128xf32>
    %103 = arith.maximumf %97, %102 : vector<8x128xf32>
    %104 = arith.subf %97, %103 : vector<8x128xf32>
    %105 = math.exp %104 : vector<8x128xf32>
    %106 = vector.extract_strided_slice %103 {offsets = [0, 0], sizes = [8, 1], strides = [1, 1]} : vector<8x128xf32> to vector<8x1xf32>
    %107 = vector.broadcast %106 : vector<8x1xf32> to vector<8x8xf32>
    %108 = arith.subf %95, %107 : vector<8x8xf32>
    %109 = math.exp %108 : vector<8x8xf32>
    %110 = arith.mulf %105, %99 : vector<8x128xf32>
    %cst_70 = arith.constant dense<0.000000e+00> : vector<8xf32>
    %111 = vector.multi_reduction <add>, %109, %cst_70 [1] : vector<8x8xf32> to vector<8xf32>
    %112 = vector.shape_cast %111 : vector<8xf32> to vector<8x1xf32>
    %113 = vector.broadcast %112 : vector<8x1xf32> to vector<8x128xf32>
    %114 = arith.addf %110, %113 : vector<8x128xf32>
    %c2_71 = arith.constant 2 : index
    %c0_72 = arith.constant 0 : index
    %c0_73 = arith.constant 0 : index
    %115 = vector.load %arg8[%c2_71, %c0_72, %c0_73] : memref<4x8x128xf32, #tpu.memory_space<vmem>>, vector<1x8x128xf32>
    %116 = vector.shape_cast %115 : vector<1x8x128xf32> to vector<8x128xf32>
    %117 = vector.shape_cast %114 : vector<8x128xf32> to vector<1x8x128xf32>
    tpu.vector_store %arg8[%c2_71, %c0_72, %c0_73], %117 {strides = array<i32>} : memref<4x8x128xf32, #tpu.memory_space<vmem>>, vector<1x8x128xf32>,
    %c2_74 = arith.constant 2 : index
    %c0_75 = arith.constant 0 : index
    %c0_76 = arith.constant 0 : index
    %118 = vector.load %arg7[%c2_74, %c0_75, %c0_76] : memref<4x8x128xf32, #tpu.memory_space<vmem>>, vector<1x8x128xf32>
    %119 = vector.shape_cast %118 : vector<1x8x128xf32> to vector<8x128xf32>
    %120 = vector.shape_cast %103 : vector<8x128xf32> to vector<1x8x128xf32>
    tpu.vector_store %arg7[%c2_74, %c0_75, %c0_76], %120 {strides = array<i32>} : memref<4x8x128xf32, #tpu.memory_space<vmem>>, vector<1x8x128xf32>,
    %121 = arith.truncf %109 : vector<8x8xf32> to vector<8x8xbf16>
    %cst_77 = arith.constant dense<0.000000e+00> : vector<8x8xf32>
    %122 = tpu.matmul %121, %92, %cst_77 {dimension_numbers = #tpu.dot_dimension_numbers<[1], [0], [0], [1], [0, 0, 1, 1], [], []>} : vector<8x8xbf16>, vector<8x8xbf16>, vector<8x8xf32> -> vector<8x8xf32>
    %123 = vector.extract_strided_slice %105 {offsets = [0, 0], sizes = [8, 8], strides = [1, 1]} : vector<8x128xf32> to vector<8x8xf32>
    %c0_78 = arith.constant 0 : index
    %c16_79 = arith.constant 16 : index
    %124 = vector.load %arg9[%c0_78, %c16_79] : memref<8x32xf32, #tpu.memory_space<vmem>>, vector<8x8xf32>
    %125 = arith.mulf %123, %124 : vector<8x8xf32>
    %126 = arith.addf %125, %122 : vector<8x8xf32>
    %c0_80 = arith.constant 0 : index
    %c16_81 = arith.constant 16 : index
    %127 = vector.load %arg9[%c0_80, %c16_81] : memref<8x32xf32, #tpu.memory_space<vmem>>, vector<8x8xf32>
    tpu.vector_store %arg9[%c0_80, %c16_81], %126 {strides = array<i32>} : memref<8x32xf32, #tpu.memory_space<vmem>>, vector<8x8xf32>,
    %c0_82 = arith.constant 0 : index
    %c0_83 = arith.constant 0 : index
    %c24 = arith.constant 24 : index
    %128 = vector.load %arg3[%c0_82, %c0_83, %c24] : memref<1x8x32xbf16, #tpu.memory_space<vmem>>, vector<1x8x8xbf16>
    %129 = vector.shape_cast %128 : vector<1x8x8xbf16> to vector<8x8xbf16>
    %c0_84 = arith.constant 0 : index
    %c0_85 = arith.constant 0 : index
    %c24_86 = arith.constant 24 : index
    %130 = vector.load %arg4[%c0_84, %c0_85, %c24_86] : memref<1x8x64xbf16, #tpu.memory_space<vmem>>, vector<1x8x8xbf16>
    %131 = vector.shape_cast %130 : vector<1x8x8xbf16> to vector<8x8xbf16>
    %c0_87 = arith.constant 0 : index
    %c0_88 = arith.constant 0 : index
    %c56 = arith.constant 56 : index
    %132 = vector.load %arg4[%c0_87, %c0_88, %c56] : memref<1x8x64xbf16, #tpu.memory_space<vmem>>, vector<1x8x8xbf16>
    %133 = vector.shape_cast %132 : vector<1x8x8xbf16> to vector<8x8xbf16>
    %cst_89 = arith.constant dense<0.000000e+00> : vector<8x8xf32>
    %134 = tpu.matmul %129, %131, %cst_89 {dimension_numbers = #tpu.dot_dimension_numbers<[1], [1], [0], [0], [0, 0, 1, 0], [], []>} : vector<8x8xbf16>, vector<8x8xbf16>, vector<8x8xf32> -> vector<8x8xf32>
    %135 = vector.broadcast %4 : vector<1x8xf32> to vector<8x8xf32>
    %136 = arith.addf %134, %135 : vector<8x8xf32>
    %c3 = arith.constant 3 : index
    %c0_90 = arith.constant 0 : index
    %c0_91 = arith.constant 0 : index
    %137 = vector.load %arg7[%c3, %c0_90, %c0_91] : memref<4x8x128xf32, #tpu.memory_space<vmem>>, vector<1x8x128xf32>
    %138 = vector.shape_cast %137 : vector<1x8x128xf32> to vector<8x128xf32>
    %c3_92 = arith.constant 3 : index
    %c0_93 = arith.constant 0 : index
    %c0_94 = arith.constant 0 : index
    %139 = vector.load %arg8[%c3_92, %c0_93, %c0_94] : memref<4x8x128xf32, #tpu.memory_space<vmem>>, vector<1x8x128xf32>
    %140 = vector.shape_cast %139 : vector<1x8x128xf32> to vector<8x128xf32>
    %cst_95 = arith.constant dense<0xFF800000> : vector<8xf32>
    %141 = vector.multi_reduction <maximumf>, %136, %cst_95 [1] : vector<8x8xf32> to vector<8xf32>
    %142 = vector.shape_cast %141 : vector<8xf32> to vector<8x1xf32>
    %143 = vector.broadcast %142 : vector<8x1xf32> to vector<8x128xf32>
    %144 = arith.maximumf %138, %143 : vector<8x128xf32>
    %145 = arith.subf %138, %144 : vector<8x128xf32>
    %146 = math.exp %145 : vector<8x128xf32>
    %147 = vector.extract_strided_slice %144 {offsets = [0, 0], sizes = [8, 1], strides = [1, 1]} : vector<8x128xf32> to vector<8x1xf32>
    %148 = vector.broadcast %147 : vector<8x1xf32> to vector<8x8xf32>
    %149 = arith.subf %136, %148 : vector<8x8xf32>
    %150 = math.exp %149 : vector<8x8xf32>
    %151 = arith.mulf %146, %140 : vector<8x128xf32>
    %cst_96 = arith.constant dense<0.000000e+00> : vector<8xf32>
    %152 = vector.multi_reduction <add>, %150, %cst_96 [1] : vector<8x8xf32> to vector<8xf32>
    %153 = vector.shape_cast %152 : vector<8xf32> to vector<8x1xf32>
    %154 = vector.broadcast %153 : vector<8x1xf32> to vector<8x128xf32>
    %155 = arith.addf %151, %154 : vector<8x128xf32>
    %c3_97 = arith.constant 3 : index
    %c0_98 = arith.constant 0 : index
    %c0_99 = arith.constant 0 : index
    %156 = vector.load %arg8[%c3_97, %c0_98, %c0_99] : memref<4x8x128xf32, #tpu.memory_space<vmem>>, vector<1x8x128xf32>
    %157 = vector.shape_cast %156 : vector<1x8x128xf32> to vector<8x128xf32>
    %158 = vector.shape_cast %155 : vector<8x128xf32> to vector<1x8x128xf32>
    tpu.vector_store %arg8[%c3_97, %c0_98, %c0_99], %158 {strides = array<i32>} : memref<4x8x128xf32, #tpu.memory_space<vmem>>, vector<1x8x128xf32>,
    %c3_100 = arith.constant 3 : index
    %c0_101 = arith.constant 0 : index
    %c0_102 = arith.constant 0 : index
    %159 = vector.load %arg7[%c3_100, %c0_101, %c0_102] : memref<4x8x128xf32, #tpu.memory_space<vmem>>, vector<1x8x128xf32>
    %160 = vector.shape_cast %159 : vector<1x8x128xf32> to vector<8x128xf32>
    %161 = vector.shape_cast %144 : vector<8x128xf32> to vector<1x8x128xf32>
    tpu.vector_store %arg7[%c3_100, %c0_101, %c0_102], %161 {strides = array<i32>} : memref<4x8x128xf32, #tpu.memory_space<vmem>>, vector<1x8x128xf32>,
    %162 = arith.truncf %150 : vector<8x8xf32> to vector<8x8xbf16>
    %cst_103 = arith.constant dense<0.000000e+00> : vector<8x8xf32>
    %163 = tpu.matmul %162, %133, %cst_103 {dimension_numbers = #tpu.dot_dimension_numbers<[1], [0], [0], [1], [0, 0, 1, 1], [], []>} : vector<8x8xbf16>, vector<8x8xbf16>, vector<8x8xf32> -> vector<8x8xf32>
    %164 = vector.extract_strided_slice %146 {offsets = [0, 0], sizes = [8, 8], strides = [1, 1]} : vector<8x128xf32> to vector<8x8xf32>
    %c0_104 = arith.constant 0 : index
    %c24_105 = arith.constant 24 : index
    %165 = vector.load %arg9[%c0_104, %c24_105] : memref<8x32xf32, #tpu.memory_space<vmem>>, vector<8x8xf32>
    %166 = arith.mulf %164, %165 : vector<8x8xf32>
    %167 = arith.addf %166, %163 : vector<8x8xf32>
    %c0_106 = arith.constant 0 : index
    %c24_107 = arith.constant 24 : index
    %168 = vector.load %arg9[%c0_106, %c24_107] : memref<8x32xf32, #tpu.memory_space<vmem>>, vector<8x8xf32>
    tpu.vector_store %arg9[%c0_106, %c24_107], %167 {strides = array<i32>} : memref<8x32xf32, #tpu.memory_space<vmem>>, vector<8x8xf32>,
    %c0_i32_108 = arith.constant 0 : i32
    %169 = arith.cmpi eq, %arg2, %c0_i32_108 : i32
    %170 = arith.extui %169 : i1 to i32
    %c0_i32_109 = arith.constant 0 : i32
    %171 = arith.cmpi ne, %170, %c0_i32_109 : i32
    scf.if %171 {
      %c0_110 = arith.constant 0 : index
      %c0_111 = arith.constant 0 : index
      %c0_112 = arith.constant 0 : index
      %172 = vector.load %arg8[%c0_110, %c0_111, %c0_112] : memref<4x8x128xf32, #tpu.memory_space<vmem>>, vector<1x8x128xf32>
      %173 = vector.shape_cast %172 : vector<1x8x128xf32> to vector<8x128xf32>
      %174 = tpu.reciprocal %173 {approx = true} : vector<8x128xf32> -> vector<8x128xf32>
      %175 = vector.extract_strided_slice %174 {offsets = [0, 0], sizes = [8, 8], strides = [1, 1]} : vector<8x128xf32> to vector<8x8xf32>
      %c1_113 = arith.constant 1 : index
      %c0_114 = arith.constant 0 : index
      %c0_115 = arith.constant 0 : index
      %176 = vector.load %arg8[%c1_113, %c0_114, %c0_115] : memref<4x8x128xf32, #tpu.memory_space<vmem>>, vector<1x8x128xf32>
      %177 = vector.shape_cast %176 : vector<1x8x128xf32> to vector<8x128xf32>
      %178 = tpu.reciprocal %177 {approx = true} : vector<8x128xf32> -> vector<8x128xf32>
      %179 = vector.extract_strided_slice %178 {offsets = [0, 0], sizes = [8, 8], strides = [1, 1]} : vector<8x128xf32> to vector<8x8xf32>
      %c2_116 = arith.constant 2 : index
      %c0_117 = arith.constant 0 : index
      %c0_118 = arith.constant 0 : index
      %180 = vector.load %arg8[%c2_116, %c0_117, %c0_118] : memref<4x8x128xf32, #tpu.memory_space<vmem>>, vector<1x8x128xf32>
      %181 = vector.shape_cast %180 : vector<1x8x128xf32> to vector<8x128xf32>
      %182 = tpu.reciprocal %181 {approx = true} : vector<8x128xf32> -> vector<8x128xf32>
      %183 = vector.extract_strided_slice %182 {offsets = [0, 0], sizes = [8, 8], strides = [1, 1]} : vector<8x128xf32> to vector<8x8xf32>
      %c3_119 = arith.constant 3 : index
      %c0_120 = arith.constant 0 : index
      %c0_121 = arith.constant 0 : index
      %184 = vector.load %arg8[%c3_119, %c0_120, %c0_121] : memref<4x8x128xf32, #tpu.memory_space<vmem>>, vector<1x8x128xf32>
      %185 = vector.shape_cast %184 : vector<1x8x128xf32> to vector<8x128xf32>
      %186 = tpu.reciprocal %185 {approx = true} : vector<8x128xf32> -> vector<8x128xf32>
      %187 = vector.extract_strided_slice %186 {offsets = [0, 0], sizes = [8, 8], strides = [1, 1]} : vector<8x128xf32> to vector<8x8xf32>
      %188 = tpu.concatenate %175, %179, %183, %187 in 1 : vector<8x8xf32>, vector<8x8xf32>, vector<8x8xf32>, vector<8x8xf32> -> vector<8x32xf32>
      %c0_122 = arith.constant 0 : index
      %c0_123 = arith.constant 0 : index
      %189 = vector.load %arg9[%c0_122, %c0_123] : memref<8x32xf32, #tpu.memory_space<vmem>>, vector<8x32xf32>
      %190 = arith.mulf %189, %188 : vector<8x32xf32>
      %191 = arith.truncf %190 : vector<8x32xf32> to vector<8x32xbf16>
      %c0_124 = arith.constant 0 : index
      %c0_125 = arith.constant 0 : index
      %c0_126 = arith.constant 0 : index
      %192 = vector.load %arg6[%c0_124, %c0_125, %c0_126] : memref<1x8x32xbf16, #tpu.memory_space<vmem>>, vector<1x8x32xbf16>
      %193 = vector.shape_cast %192 : vector<1x8x32xbf16> to vector<8x32xbf16>
      %194 = vector.shape_cast %191 : vector<8x32xbf16> to vector<1x8x32xbf16>
      tpu.vector_store %arg6[%c0_124, %c0_125, %c0_126], %194 {strides = array<i32>} : memref<1x8x32xbf16, #tpu.memory_space<vmem>>, vector<1x8x32xbf16>,
    } else {
    }
    return
  }
  func.func @transform_0(%arg0: i32, %arg1: i32, %arg2: i32) -> (i32, i32, i32) {
    %c0_i32 = arith.constant 0 : i32
    %c0_i32_0 = arith.constant 0 : i32
    return %arg0, %arg1, %c0_i32 : i32, i32, i32
  }
  func.func @transform_1(%arg0: i32, %arg1: i32, %arg2: i32) -> (i32, i32, i32) {
    %c0_i32 = arith.constant 0 : i32
    %c0_i32_0 = arith.constant 0 : i32
    return %arg0, %arg2, %c0_i32 : i32, i32, i32
  }
  func.func @transform_2(%arg0: i32, %arg1: i32, %arg2: i32) -> (i32, i32, i32) {
    %c0_i32 = arith.constant 0 : i32
    %c0_i32_0 = arith.constant 0 : i32
    return %arg0, %c0_i32, %arg2 : i32, i32, i32
  }
  func.func @transform_3(%arg0: i32, %arg1: i32, %arg2: i32) -> (i32, i32, i32) {
    %c0_i32 = arith.constant 0 : i32
    %c0_i32_0 = arith.constant 0 : i32
    return %arg0, %arg1, %c0_i32 : i32, i32, i32
  }
}

module attributes {stable_mosaic.version = 11 : i64} {
  func.func @_linear_bias_kernel(%arg0: i32, %arg1: i32, %arg2: i32, %arg3: memref<16x32xbf16, #tpu.memory_space<vmem>>, %arg4: memref<32x32xbf16, #tpu.memory_space<vmem>>, %arg5: memref<1x32xf32, #tpu.memory_space<vmem>>, %arg6: memref<16x32xf32, #tpu.memory_space<vmem>>, %arg7: memref<16x32xf32, #tpu.memory_space<vmem>>) attributes {dimension_semantics = [#tpu.dimension_semantics<parallel>, #tpu.dimension_semantics<parallel>, #tpu.dimension_semantics<arbitrary>], iteration_bounds = array<i64: 1, 1, 1>, scalar_prefetch = 0 : i64, scratch_operands = 1 : i64, tpu.core_type = #tpu.core_type<tc>, window_params = [{transform_indices = @transform_0, window_bounds = array<i64: 16, 32>}, {transform_indices = @transform_1, window_bounds = array<i64: 32, 32>}, {transform_indices = @transform_2, window_bounds = array<i64: 1, 32>}, {transform_indices = @transform_3, window_bounds = array<i64: 16, 32>}]} {
    %c0_i32 = arith.constant 0 : i32
    %0 = arith.cmpi eq, %arg2, %c0_i32 : i32
    %1 = arith.extui %0 : i1 to i32
    %c0_i32_0 = arith.constant 0 : i32
    %2 = arith.cmpi ne, %1, %c0_i32_0 : i32
    scf.if %2 {
      %cst_10 = arith.constant 0.000000e+00 : f32
      %12 = vector.broadcast %cst_10 : f32 to vector<16x32xf32>
      %c0_11 = arith.constant 0 : index
      %c0_12 = arith.constant 0 : index
      %13 = vector.load %arg7[%c0_11, %c0_12] : memref<16x32xf32, #tpu.memory_space<vmem>>, vector<16x32xf32>
      tpu.vector_store %arg7[%c0_11, %c0_12], %12 {strides = array<i32>} : memref<16x32xf32, #tpu.memory_space<vmem>>, vector<16x32xf32>,
    } else {
    }
    %c0 = arith.constant 0 : index
    %c0_1 = arith.constant 0 : index
    %3 = vector.load %arg7[%c0, %c0_1] : memref<16x32xf32, #tpu.memory_space<vmem>>, vector<16x32xf32>
    %c0_2 = arith.constant 0 : index
    %c0_3 = arith.constant 0 : index
    %4 = vector.load %arg3[%c0_2, %c0_3] : memref<16x32xbf16, #tpu.memory_space<vmem>>, vector<16x32xbf16>
    %c0_4 = arith.constant 0 : index
    %c0_5 = arith.constant 0 : index
    %5 = vector.load %arg4[%c0_4, %c0_5] : memref<32x32xbf16, #tpu.memory_space<vmem>>, vector<32x32xbf16>
    %cst = arith.constant dense<0.000000e+00> : vector<16x32xf32>
    %6 = tpu.matmul %4, %5, %cst {dimension_numbers = #tpu.dot_dimension_numbers<[1], [0], [0], [1], [0, 0, 1, 1], [], []>} : vector<16x32xbf16>, vector<32x32xbf16>, vector<16x32xf32> -> vector<16x32xf32>
    %7 = arith.addf %3, %6 : vector<16x32xf32>
    %c0_6 = arith.constant 0 : index
    %c0_7 = arith.constant 0 : index
    %8 = vector.load %arg7[%c0_6, %c0_7] : memref<16x32xf32, #tpu.memory_space<vmem>>, vector<16x32xf32>
    tpu.vector_store %arg7[%c0_6, %c0_7], %7 {strides = array<i32>} : memref<16x32xf32, #tpu.memory_space<vmem>>, vector<16x32xf32>,
    %c0_i32_8 = arith.constant 0 : i32
    %9 = arith.cmpi eq, %arg2, %c0_i32_8 : i32
    %10 = arith.extui %9 : i1 to i32
    %c0_i32_9 = arith.constant 0 : i32
    %11 = arith.cmpi ne, %10, %c0_i32_9 : i32
    scf.if %11 {
      %c0_10 = arith.constant 0 : index
      %c0_11 = arith.constant 0 : index
      %12 = vector.load %arg7[%c0_10, %c0_11] : memref<16x32xf32, #tpu.memory_space<vmem>>, vector<16x32xf32>
      %c0_12 = arith.constant 0 : index
      %c0_13 = arith.constant 0 : index
      %13 = vector.load %arg5[%c0_12, %c0_13] : memref<1x32xf32, #tpu.memory_space<vmem>>, vector<1x32xf32>
      %14 = vector.broadcast %13 : vector<1x32xf32> to vector<16x32xf32>
      %15 = arith.addf %12, %14 : vector<16x32xf32>
      %c0_14 = arith.constant 0 : index
      %c0_15 = arith.constant 0 : index
      %16 = vector.load %arg6[%c0_14, %c0_15] : memref<16x32xf32, #tpu.memory_space<vmem>>, vector<16x32xf32>
      tpu.vector_store %arg6[%c0_14, %c0_15], %15 {strides = array<i32>} : memref<16x32xf32, #tpu.memory_space<vmem>>, vector<16x32xf32>,
    } else {
    }
    return
  }
  func.func @transform_0(%arg0: i32, %arg1: i32, %arg2: i32) -> (i32, i32) {
    %c0_i32 = arith.constant 0 : i32
    return %arg0, %arg2 : i32, i32
  }
  func.func @transform_1(%arg0: i32, %arg1: i32, %arg2: i32) -> (i32, i32) {
    %c0_i32 = arith.constant 0 : i32
    return %arg2, %arg1 : i32, i32
  }
  func.func @transform_2(%arg0: i32, %arg1: i32, %arg2: i32) -> (i32, i32) {
    %c0_i32 = arith.constant 0 : i32
    %c0_i32_0 = arith.constant 0 : i32
    return %c0_i32, %arg1 : i32, i32
  }
  func.func @transform_3(%arg0: i32, %arg1: i32, %arg2: i32) -> (i32, i32) {
    %c0_i32 = arith.constant 0 : i32
    return %arg0, %arg1 : i32, i32
  }
}

</mosaic_0001>

<bundles_post_ra>
// kernel: gat_block_forward.4
= control target key start
LH: loop header
LB: loop body
LE: loop exit
PB: predicated region body
PF: predicated region fallthrough
CT: control target
= control target key end

     0   :  { %vm19_vm0 = vcmask 261120   ;;  %v144_v0 = vmov 0.0   ;;  %vm145_vm1 = vmmov 0   ;;  %vm114_vm2 = vcmask 257024   ;;  %s192_s1 = inlined_call_operand.vmem [shape: bf16[32,32], index: 1, kind: input, shape index: {}]   ;;  %s193_s0 = inlined_call_operand.vmem [shape: f32[16,32], index: 0, kind: input, shape index: {}]   ;;  %s194_s2 = inlined_call_operand.vmem [shape: f32[1,32], index: 2, kind: input, shape index: {}]   ;;  %s195_s3 = inlined_call_operand.vmem [shape: bf16[16,32], index: 3, kind: output, shape index: {}]  }
   0x1   :  { %132 = vmatprep.subr.bf16.mxu0 %v144_v0  ;;  %v142_v1 = vld [vmem:[%s192_s1 + $0x8] sm:$0xff]   ;;  %136 = vmatprep.mubr.msk.bf16.mxu0 %vm145_vm1, %v144_v0  ;;  %20 = vst.msk [vmem:[#allocation2] sm:$0xff] %vm19_vm0, %v144_v0  ;;  %21 = vst.msk [vmem:[#allocation2 + $0x8] sm:$0xff] %vm19_vm0, %v144_v0  ;;  %v143_v2 = vld [vmem:[%s192_s1] sm:$0xff]  }
   0x2   :  { %133 = vmatpush3.bf16.msra.mxu0 %v142_v1  ;;  %v24_v3 = vld [vmem:[%s193_s0] sm:$0xff]  ;;  %v25_v4 = vld [vmem:[%s193_s0 + $0x8] sm:$0xff] }
   0x3   :  { %134 = vmatprep.subr.bf16.mxu0 %v144_v0  ;;  %v26_v5 = vpack.c.bf16 %v25_v4, %v24_v3  ;;  %v124_v14 = vld [vmem:[%s194_s2] ss:$0 sm:$0xff] }
   0x6   :  { %135 = vmatpush3.bf16.msra.mxu0 %v143_v2 }
   0x8   :  { %v22_v6 = vld [vmem:[#allocation2] sm:$0xff]  ;;  %v23_v10 = vld [vmem:[#allocation2 + $0x8] sm:$0xff] }
   0x9   :  { %137 = vmatmul.mubr.msk.bf16.vlgmr.msra.gmra.mxu0 %vm19_vm0, %v26_v5 }
  0xc9   :  { %v81_v7 = vpop.f32.mrf.mxu0 }
  0xca   :  { %v88_v8 = vadd.f32 %v81_v7, %v22_v6 }
  0xcb   :  { %v138_v9 = vpop.f32.mrf.mxu0 }
  0xcc   :  { %90 = vst.msk [vmem:[#allocation2] sm:$0xff] %vm19_vm0, %v88_v8 }
  0xcd   :  { %v84_v11 = vpop.f32.mrf.mxu0 }
  0xce   :  { %v89_v12 = vadd.f32 %v84_v11, %v23_v10 }
  0xcf   :  { %v139_v13 = vpop.f32.mrf.mxu0 }
  0xd0   :  { %91 = vst.msk [vmem:[#allocation2 + $0x8] sm:$0xff] %vm19_vm0, %v89_v12 }
  0xd3   :  { %v95_v15 = vld [vmem:[#allocation2] sm:$0xff] }
  0xd4   :  { %v104_v16 = vadd.f32 %v124_v14, %v95_v15 }
  0xd6   :  { %v127_v17 = vpack.c.bf16 %v104_v16, %v104_v16 }
  0xd7   :  { %v96_v18 = vld [vmem:[#allocation2 + $0x8] sm:$0xff] }
  0xd8   :  { %115 = vst.msk [vmem:[%s195_s3] sm:$0xf] %vm114_vm2, %v127_v17  ;;  %v105_v19 = vadd.f32 %v124_v14, %v96_v18 }
  0xda   :  { %v128_v20 = vpack.c.bf16 %v105_v19, %v105_v19 }
  0xdc   :  { %116 = vst.msk [vmem:[%s195_s3 + $0x4] sm:$0xf] %vm114_vm2, %v128_v20 }

// kernel: gat_block_forward.5
= control target key start
LH: loop header
LB: loop body
LE: loop exit
PB: predicated region body
PF: predicated region fallthrough
CT: control target
= control target key end

     0   :  { %vm19_vm0 = vcmask 523264   ;;  %v145_v0 = vmov 0.0   ;;  %vm146_vm1 = vmmov 0   ;;  %vm43_vm2 = vcmask 261120   ;;  %s192_s1 = inlined_call_operand.vmem [shape: bf16[32,64], index: 1, kind: input, shape index: {}]   ;;  %s193_s0 = inlined_call_operand.vmem [shape: f32[16,32], index: 0, kind: input, shape index: {}]   ;;  %s194_s2 = inlined_call_operand.vmem [shape: f32[1,64], index: 2, kind: input, shape index: {}]   ;;  %s195_s3 = inlined_call_operand.vmem [shape: bf16[16,64], index: 3, kind: output, shape index: {}]  }
   0x1   :  { %133 = vmatprep.subr.bf16.mxu0 %v145_v0  ;;  %v143_v1 = vld [vmem:[%s192_s1 + $0x8] sm:$0xff]   ;;  %137 = vmatprep.mubr.msk.bf16.mxu0 %vm146_vm1, %v145_v0  ;;  %20 = vst.msk [vmem:[#allocation2] sm:$0xff] %vm19_vm0, %v145_v0  ;;  %21 = vst.msk [vmem:[#allocation2 + $0x8] sm:$0xff] %vm19_vm0, %v145_v0  ;;  %v144_v2 = vld [vmem:[%s192_s1] sm:$0xff]   ;;  %vm115_vm3 = vcmask 519168  }
   0x2   :  { %134 = vmatpush3.bf16.msra.mxu0 %v143_v1  ;;  %v24_v3 = vld [vmem:[%s193_s0] sm:$0xff]  ;;  %v25_v4 = vld [vmem:[%s193_s0 + $0x8] sm:$0xff] }
   0x3   :  { %135 = vmatprep.subr.bf16.mxu0 %v145_v0  ;;  %v26_v5 = vpack.c.bf16 %v25_v4, %v24_v3  ;;  %v125_v14 = vld [vmem:[%s194_s2] ss:$0 sm:$0xff] }
   0x6   :  { %136 = vmatpush3.bf16.msra.mxu0 %v144_v2 }
   0x8   :  { %v22_v6 = vld [vmem:[#allocation2] sm:$0xff]  ;;  %v23_v10 = vld [vmem:[#allocation2 + $0x8] sm:$0xff] }
   0x9   :  { %138 = vmatmul.mubr.msk.bf16.vlgmr.msra.gmra.mxu0 %vm43_vm2, %v26_v5 }
  0xc9   :  { %v81_v7 = vpop.f32.mrf.mxu0 }
  0xca   :  { %v88_v8 = vadd.f32 %v81_v7, %v22_v6 }
  0xcb   :  { %v139_v9 = vpop.f32.mrf.mxu0 }
  0xcc   :  { %91 = vst.msk [vmem:[#allocation2] sm:$0xff] %vm19_vm0, %v88_v8 }
  0xcd   :  { %v84_v11 = vpop.f32.mrf.mxu0 }
  0xce   :  { %v89_v12 = vadd.f32 %v84_v11, %v23_v10 }
  0xcf   :  { %v140_v13 = vpop.f32.mrf.mxu0 }
  0xd0   :  { %92 = vst.msk [vmem:[#allocation2 + $0x8] sm:$0xff] %vm19_vm0, %v89_v12 }
  0xd3   :  { %v96_v15 = vld [vmem:[#allocation2] sm:$0xff] }
  0xd4   :  { %v105_v16 = vadd.f32 %v125_v14, %v96_v15 }
  0xd6   :  { %v128_v17 = vpack.c.bf16 %v105_v16, %v105_v16 }
  0xd7   :  { %v97_v18 = vld [vmem:[#allocation2 + $0x8] sm:$0xff] }
  0xd8   :  { %116 = vst.msk [vmem:[%s195_s3] sm:$0xf] %vm115_vm3, %v128_v17  ;;  %v106_v19 = vadd.f32 %v125_v14, %v97_v18 }
  0xda   :  { %v129_v20 = vpack.c.bf16 %v106_v19, %v106_v19 }
  0xdc   :  { %117 = vst.msk [vmem:[%s195_s3 + $0x4] sm:$0xf] %vm115_vm3, %v129_v20 }

// kernel: gat_block_forward.7
= control target key start
LH: loop header
LB: loop body
LE: loop exit
PB: predicated region body
PF: predicated region fallthrough
CT: control target
= control target key end

     0   :  { %v175_v1 = vmov 0.0   ;;  %vm176_vm0 = vmmov 0   ;;  %vm20_vm1 = vcmask 261120   ;;  %s222_s0 = inlined_call_operand.vmem [shape: bf16[16,32], index: 0, kind: input, shape index: {}]   ;;  %s223_s1 = inlined_call_operand.vmem [shape: bf16[32,32], index: 1, kind: input, shape index: {}]   ;;  %s224_s2 = inlined_call_operand.vmem [shape: f32[1,32], index: 2, kind: input, shape index: {}]   ;;  %s225_s3 = inlined_call_operand.hbm [shape: f32[16,32], index: 3, kind: output, shape index: {}]  }
   0x1   :  { %v150_v0 = vld [vmem:[%s223_s1 + $0x8] sm:$0xff]   ;;  %137 = vmatprep.subr.bf16.mxu0 %v175_v1  ;;  %v151_v2 = vld [vmem:[%s223_s1] sm:$0xff]   ;;  %141 = vmatprep.mubr.msk.bf16.mxu0 %vm176_vm0, %v175_v1  ;;  %21 = vst.msk [vmem:[#allocation2] sm:$0xff] %vm20_vm1, %v175_v1  ;;  %22 = vst.msk [vmem:[#allocation2 + $0x8] sm:$0xff] %vm20_vm1, %v175_v1 }
   0x2   :  { %138 = vmatpush3.bf16.msra.mxu0 %v150_v0 }
   0x3   :  { %139 = vmatprep.subr.bf16.mxu0 %v175_v1 }
   0x4   :  { %8 = vsyncpa [#allocation4], 0  ;;  %v152_v3 = vld [vmem:[%s222_s0] sm:$0xff]   ;;  %s177_s0 = smov [#allocation3]  }
   0x5   :  { %v133_v12 = vld [vmem:[%s224_s2] ss:$0 sm:$0xff]  ;;  %s118_s19 = sshll.u32 %s177_s0, 4  ;;  %s119_s19 = int_to_ptr.vmem [resolvable:$true] %s118_s19 }
   0x6   :  { %140 = vmatpush3.bf16.msra.mxu0 %v151_v2  ;;  %s153_s20 = scalar_lea.vmem %s119_s19, 256  ;;  %p158_p1 = scmp.lt.s32.totalorder %s119_s19, %s119_s19 }
   0x7   :  { %p154_p0 = scmp.ne.s32.totalorder %s119_s19, %s153_s20  ;;  %p159_p2 = scmp.lt.s32.totalorder %s153_s20, %s153_s20 }
   0x8   :  { %v23_v4 = vld [vmem:[#allocation2] sm:$0xff]  ;;  %v24_v8 = vld [vmem:[#allocation2 + $0x8] sm:$0xff] }
   0x9   :  { %142 = vmatmul.mubr.msk.bf16.vlgmr.msra.gmra.mxu0 %vm20_vm1, %v152_v3  ;;  %p160_p3 = por %p159_p2, %p158_p1 }
   0xb   :  { %p161_p4 = pnand %p160_p3, %p154_p0 }
  0xc9   :  { %v86_v5 = vpop.f32.mrf.mxu0 }
  0xca   :  { %v93_v6 = vadd.f32 %v86_v5, %v23_v4 }
  0xcb   :  { %v143_v7 = vpop.f32.mrf.mxu0 }
  0xcc   :  { %95 = vst.msk [vmem:[#allocation2] sm:$0xff] %vm20_vm1, %v93_v6 }
  0xcd   :  { %v89_v9 = vpop.f32.mrf.mxu0 }
  0xce   :  { %v94_v10 = vadd.f32 %v89_v9, %v24_v8 }
  0xcf   :  { %v144_v11 = vpop.f32.mrf.mxu0 }
  0xd0   :  { %96 = vst.msk [vmem:[#allocation2 + $0x8] sm:$0xff] %vm20_vm1, %v94_v10 }
  0xd3   :  { %v100_v13 = vld [vmem:[#allocation2] sm:$0xff] }
  0xd4   :  { %v109_v14 = vadd.f32 %v133_v12, %v100_v13 }
  0xd6   :  { %111 = vst.msk [vmem:[#allocation3] sm:$0xff] %vm20_vm1, %v109_v14 }
  0xd7   :  { %v101_v15 = vld [vmem:[#allocation2 + $0x8] sm:$0xff] }
  0xd8   :  { %v110_v16 = vadd.f32 %v133_v12, %v101_v15 }
  0xda   :  { %112 = vst.msk [vmem:[#allocation3 + $0x8] sm:$0xff] %vm20_vm1, %v110_v16 }
  0xdb   :  { %164 = shalt.err (!%p161_p4)
}
  0xdc   :  { %s178_s21 = smov 128   ;;  %s179_s2 = smov 8  }
  0xdd   :  { %124 = dma.vmem_to_hbm [thread:$0]  %s119_s19, 256, %s225_s3, [#allocation4], %s178_s21, %s178_s21, %s179_s2  }
  0xde   :  { %173 = dma.done.wait [#allocation4], 256  }
  0xdf   :  { %174 = vsyncadd [#allocation4], 4294967040 }
  0xe0   :  { %128 = vsyncpa [#allocation4], 1 }

// kernel: gat_block_forward.6
= control target key start
LH: loop header
LB: loop body
LE: loop exit
PB: predicated region body
PF: predicated region fallthrough
CT: control target
= control target key end

     0   :  { %s1201_s12 = smov 0   ;;  %s1203_s13 = smov 0   ;;  %s1351_s0 = inlined_call_operand.vmem [shape: bf16[2,8,32], index: 0, kind: input, shape index: {}]   ;;  %s1352_s1 = inlined_call_operand.vmem [shape: bf16[2,8,64], index: 1, kind: input, shape index: {}]   ;;  %s1353_s2 = inlined_call_operand.vmem [shape: f32[2,1,8], index: 2, kind: input, shape index: {}]   ;;  %s1354_s3 = inlined_call_operand.vmem [shape: bf16[2,8,32], index: 3, kind: output, shape index: {}]  }
   0x1   :  { %s1205_s14 = smov 0  }
   0x2 LB: > { %s32_s15 = sadd.s32 1, %s1162_s13  ;;  %p988_p0 = scmp.ge.s32.totalorder %s1166_s14, 1  ;;  %s1166_s14 = sphi %s1205_s14, %s13_s14   ;;  %s1162_s13 = sphi %s1203_s13, %s1356_s13   ;;  %s1158_s12 = sphi %s1201_s12, %s1355_s12  }
   0x3   : > { %p34_p1 = scmp.ge.s32.totalorder %s32_s15, 2  ;;  %p189_p2 = scmp.lt.s32.totalorder %s1166_s14, 3 }
   0x5   : > { %s1358_s15 = smov (%p34_p1, %s32_s15), 0  ;;  %p190_p3 = pnand %p988_p0, %p189_p2 }
   0x6   : > { %p230_p4 = scmp.lt.s32.totalorder (!%p190_p3), %s1158_s12, 1  ;;  %s1171_s26 = smov (!%p190_p3), 96  }
   0x7   : > { %193 = sbr.rel (%p190_p3) target bundleno = 1795 (0x703), region = 32  ;;  %s1172_s27 = smov (!%p190_p3), 120  }
   0x8   : > { %s1173_s28 = smov (!%p190_p3), 112   ;;  %s1174_s29 = smov (!%p190_p3), 104  }
   0x9   : > { %s1175_s30 = smov (!%p190_p3), 88   ;;  %s1176_s4 = smov (!%p190_p3), 80  }
   0xa   : > { %s1177_s5 = smov (!%p190_p3), 8   ;;  %s1178_s6 = smov (!%p190_p3), 72  }
   0xb   : > { %s1179_s7 = smov (!%p190_p3), 16   ;;  %s1180_s8 = smov (!%p190_p3), 24  }
   0xc   : > { %v1168_v0 = vmov 0.0   ;;  %vm1169_vm0 = vmmov 0   ;;  %s1360_s12 = smov (!%p230_p4, %s1158_s12), 1  ;;  %vm281_vm1 = vcmask 64512   ;;  %v1170_v4 = vmov 0  }
   0xd   : > { %1026 = vmatprep.subr.bf16.mxu0 %v1168_v0  ;;  %1028 = vmatprep.mubr.msk.bf16.mxu0 %vm1169_vm0, %v1168_v0  ;;  %s1225_s16 = sshll.u32 %s1360_s12, 2  ;;  %s249_s25 = scalar_lea.vmem %s1353_s2, %s1360_s12  ;;  %vm270_vm2 = vcmask 261120   ;;  %vm361_vm3 = vcmask 1043456   ;;  %vm553_vm4 = vcmask 130112   ;;  %vm699_vm5 = vcmask 195712  }
   0xe   : > { %1032 = vmatprep.subr.bf16.mxu1 %v1168_v0  ;;  %1034 = vmatprep.mubr.msk.bf16.mxu1 %vm1169_vm0, %v1168_v0  ;;  %s1231_s19 = scalar_lea.vmem %s1352_s1, %s1225_s16  ;;  %s1238_s22 = scalar_lea.vmem %s1351_s0, %s1225_s16  ;;  %v1249_v5 = vld [vmem:[%s249_s25] ss:$0 sm:$0xff]  ;;  %271 = vst.msk [vmem:[#allocation4] sm:$0xff] %vm270_vm2, %v1168_v0  ;;  %vm845_vm6 = vcmask 261312   ;;  %vm871_vm7 = vcmask 130048   ;;  %vm873_vm8 = vcmask 195584  }
   0xf   : > { %v274_v1 = vld [vmem:[%s1231_s19] sm:$0xf]  ;;  %1111 = vset.pattern.permute.xlu0 %v1170_v4  ;;  %1112 = vset.pattern.permute.xlu1 %v1170_v4  ;;  %s256_s11 = scalar_lea.vmem %s1354_s3, %s1225_s16  ;;  %vm878_vm9 = vcmask 257024  }
  0x10   : > { %v286_v2 = vsel %vm281_vm1, %v274_v1, 0  ;;  %v273_v3 = vld [vmem:[%s1238_s22] sm:$0xf]  ;;  %v994_v12 = vcombine.low %v274_v1, %v274_v1 }
  0x11   : > { %1027 = vmatpush3.bf16.xpose.msra.mxu0 %v286_v2  ;;  %v1254_v13 = vld [vmem:[%s1231_s19] ss:$0 sps:$4 sm:$0xff]  }
  0x12   : > { %1044 = vmatprep.subr.bf16.mxu0 %v1168_v0  ;;  %356 = vrot.lane.b32.xlu1 %v994_v12, %s1171_s26  ;;  %v1115_v14 = vld [vmem:[%s1238_s22] ss:$0 sps:$4 sm:$0xff]  }
  0x13   : > { %v1264_v18 = vld [vmem:[%s1231_s19] ss:$0 sps:$4 sm:$0xff]  }
  0x14   : > { %v1117_v19 = vld [vmem:[%s1238_s22] ss:$0 sps:$4 sm:$0xff]  }
  0x15   : > { %v1271_v20 = vld [vmem:[%s1231_s19] ss:$0 sps:$4 sm:$0xff]  }
  0x16   : > { %419 = vrot.lane.b32.xlu1 %v1254_v13, %s1172_s27  ;;  %v1119_v32 = vld [vmem:[%s1238_s22] ss:$0 sps:$4 sm:$0xff]  }
  0x17   : > { %v405_v38 = vld [vmem:[#allocation4] sm:$0xff] }
  0x18   : > { %1029 = vmatmul.mubr.msk.bf16.vlgmr.msra.gmra.mxu0 %vm281_vm1, %v273_v3 }
  0x19   : > { %1046 = vmatprep.mubr.msk.bf16.mxu0 %vm1169_vm0, %v1168_v0 }
  0x1a   : > { %414 = vrot.lane.b32.xlu1 %v1115_v14, %s1172_s27 }
  0x1e   : > { %565 = vrot.lane.b32.xlu1 %v1264_v18, %s1173_s28 }
  0x22   : > { %560 = vrot.lane.b32.xlu1 %v1117_v19, %s1173_s28 }
  0x26   : > { %711 = vrot.lane.b32.xlu1 %v1271_v20, %s1174_s29 }
  0x84   : > { %v357_v16 = vpop.permute.xlu1 %356 }
  0x85   : > { %v363_v17 = vsel %vm361_vm3, %v357_v16, 0 }
  0x86   : > { %1033 = vmatpush3.bf16.msra.mxu1 %v363_v17 }
  0x87   : > { %1038 = vmatprep.subr.bf16.mxu1 %v1168_v0 }
  0x88   : > { %v420_v24 = vpop.permute.xlu1 %419 }
  0x89   : > { %v425_v26 = vsel %vm281_vm1, %v420_v24, 0 }
  0x8c   : > { %v415_v28 = vpop.permute.xlu1 %414 }
  0x90   : > { %v566_v29 = vpop.permute.xlu1 %565 }
  0x91   : > { %v571_v30 = vsel %vm281_vm1, %v566_v29, 0 }
  0x94   : > { %v561_v31 = vpop.permute.xlu1 %560 }
  0x98   : > { %v712_v33 = vpop.permute.xlu1 %711 }
  0x99   : > { %v717_v34 = vsel %vm281_vm1, %v712_v33, 0 }
  0xd8   : > { %v322_v6 = vpop.f32.mrf.mxu0 }
  0xd9   : > { %v323_v7 = vadd.f32 %v1249_v5, %v322_v6 }
  0xda   : > { %v1030_v8 = vpop.f32.mrf.mxu0 }
  0xdb   : > { %v330_v9 = vsel %vm281_vm1, %v323_v7, -inf }
  0xdc   : > { %331 = vmax.xlane.f32.xlu0 %v330_v9  ;;  %v325_v10 = vpop.f32.mrf.mxu0 }
  0xde   : > { %v1031_v11 = vpop.f32.mrf.mxu0 }
 0x165   : > { %v332_v15 = vpop.xlane.xlu0 %331 }
 0x166   : > { %339 = vperm.xlu0 %1111, %v332_v15   ;;  %v334_v35 = vsub.f32 -inf, %v332_v15 }
 0x168   : > { %v335_v36 = vmul.f32 1.442695, %v334_v35 }
 0x16a   : > { %706 = vrot.lane.b32.xlu0 %v1119_v32, %s1174_s29 }
 0x1e1   : > { %v340_v21 = vpop.permute.xlu0 %339 }
 0x1e2   : > { %v342_v22 = vsub.f32 %v323_v7, %v340_v21 }
 0x1e4   : > { %v343_v23 = vmul.f32 1.442695, %v342_v22 }
 0x1e5   : > { %v707_v51 = vpop.permute.xlu0 %706 }
 0x1e6   : > { %1120 = vpow2.f32 %v343_v23 }
 0x1e7   : > { %1122 = vpow2.f32 %v335_v36 }
 0x1f3   : > { %v1275_v25 = vpop.eup %1120 }
 0x1f4   : > { %v352_v27 = vpack.c.bf16 %v1275_v25, %v1275_v25  ;;  %v1295_v37 = vpop.eup %1122 }
 0x1f5   : > { %v406_v39 = vmul.f32 %v1295_v37, %v405_v38 }
 0x1f6   : > { %1035 = vmatmul.mubr.msk.bf16.vlgmr.msra.gmra.mxu1 %vm281_vm1, %v352_v27 }
 0x1f7   : > { %1039 = vmatpush3.bf16.xpose.msra.mxu1 %v425_v26  ;;  %1040 = vmatprep.mubr.msk.bf16.mxu1 %vm1169_vm0, %v1168_v0 }
 0x1f8   : > { %1050 = vmatprep.subr.bf16.mxu1 %v1168_v0 }
 0x1fe   : > { %1041 = vmatmul.mubr.msk.bf16.vlgmr.msra.gmra.mxu1 %vm281_vm1, %v415_v28 }
 0x1ff   : > { %1051 = vmatpush3.bf16.xpose.msra.mxu1 %v571_v30  ;;  %1052 = vmatprep.mubr.msk.bf16.mxu1 %vm1169_vm0, %v1168_v0 }
 0x200   : > { %1062 = vmatprep.subr.bf16.mxu1 %v1168_v0 }
 0x206   : > { %1053 = vmatmul.mubr.msk.bf16.vlgmr.msra.gmra.mxu1 %vm281_vm1, %v561_v31 }
 0x207   : > { %1064 = vmatprep.mubr.msk.bf16.mxu1 %vm1169_vm0, %v1168_v0  ;;  %1063 = vmatpush3.bf16.xpose.msra.mxu1 %v717_v34 }
 0x20e   : > { %1065 = vmatmul.mubr.msk.bf16.vlgmr.msra.gmra.mxu1 %vm281_vm1, %v707_v51 }
 0x2b6   : > { %v399_v40 = vpop.f32.mrf.mxu1 }
 0x2b7   : > { %v407_v41 = vadd.f32 %v406_v39, %v399_v40 }
 0x2b8   : > { %v1036_v42 = vpop.f32.mrf.mxu1 }
 0x2b9   : > { %408 = vst.msk [vmem:[#allocation4] sm:$0xff] %vm281_vm1, %v407_v41 }
 0x2ba   : > { %v402_v43 = vpop.f32.mrf.mxu1 }
 0x2bc   : > { %v1037_v44 = vpop.f32.mrf.mxu1 }
 0x2be   : > { %v461_v45 = vpop.f32.mrf.mxu1 }
 0x2bf   : > { %v462_v46 = vadd.f32 %v1249_v5, %v461_v45 }
 0x2c0   : > { %v1042_v47 = vpop.f32.mrf.mxu1  ;;  %v542_v59 = vld [vmem:[#allocation4] sm:$0xff] }
 0x2c1   : > { %v471_v48 = vsel %vm281_vm1, %v462_v46, -inf }
 0x2c2   : > { %472 = vmax.xlane.f32.xlu1 %v471_v48  ;;  %v464_v49 = vpop.f32.mrf.mxu1 }
 0x2c4   : > { %v1043_v50 = vpop.f32.mrf.mxu1 }
 0x2c6   : > { %v607_v52 = vpop.f32.mrf.mxu1 }
 0x2c7   : > { %v608_v57 = vadd.f32 %v1249_v5, %v607_v52 }
 0x2c8   : > { %v1054_v53 = vpop.f32.mrf.mxu1 }
 0x2c9   : > { %v617_v58 = vsel %vm281_vm1, %v608_v57, -inf }
 0x2ca   : > { %v610_v54 = vpop.f32.mrf.mxu1 }
 0x2cc   : > { %v1055_v55 = vpop.f32.mrf.mxu1 }
 0x2ce   : > { %v753_v60 = vpop.f32.mrf.mxu1 }
 0x2cf   : > { %v754_v10 = vadd.f32 %v1249_v5, %v753_v60 }
 0x2d0   : > { %v1066_v61 = vpop.f32.mrf.mxu1 }
 0x2d1   : > { %v763_v11 = vsel %vm281_vm1, %v754_v10, -inf }
 0x2d2   : > { %v756_v62 = vpop.f32.mrf.mxu1 }
 0x2d4   : > { %v1067_v63 = vpop.f32.mrf.mxu1 }
 0x34b   : > { %v473_v56 = vpop.xlane.xlu1 %472 }
 0x34c   : > { %480 = vperm.xlu0 %1111, %v473_v56   ;;  %v475_v17 = vsub.f32 -inf, %v473_v56 }
 0x34e   : > { %v476_v22 = vmul.f32 1.442695, %v475_v17 }
 0x350   : > { %494 = vrot.lane.b32.xlu0 %v1254_v13, %s1175_s30 }
 0x36f   : > { %618 = vmax.xlane.f32.xlu0 %v617_v58 }
 0x385   : > { %544 = vrot.lane.b32.xlu0 %v542_v59, %s1172_s27 }
 0x3c7   : > { %v481_v1 = vpop.permute.xlu0 %480 }
 0x3c8   : > { %v483_v2 = vsub.f32 %v462_v46, %v481_v1 }
 0x3ca   : > { %v484_v3 = vmul.f32 1.442695, %v483_v2 }
 0x3cb   : > { %v495_v4 = vpop.permute.xlu0 %494 }
 0x3cc   : > { %1124 = vpow2.f32 %v484_v3  ;;  %v500_v6 = vsel %vm361_vm3, %v495_v4, 0 }
 0x3cd   : > { %1045 = vmatpush3.bf16.msra.mxu0 %v500_v6 }
 0x3ce   : > { %1056 = vmatprep.subr.bf16.mxu0 %v1168_v0 }
 0x3d9   : > { %v1308_v7 = vpop.eup %1124 }
 0x3da   : > { %v493_v8 = vpack.c.bf16 %v1308_v7, %v1308_v7  ;;  %v487_v50 = vsel %vm281_vm1, %v1308_v7, 0.0 }
 0x3dc   : > { %1047 = vmatmul.mubr.msk.bf16.vlgmr.msra.gmra.mxu0 %vm281_vm1, %v493_v8 }
 0x3dd   : > { %1058 = vmatprep.mubr.msk.bf16.mxu0 %vm1169_vm0, %v1168_v0 }
 0x3f8   : > { %v619_v9 = vpop.xlane.xlu0 %618 }
 0x3f9   : > { %626 = vperm.xlu1 %1112, %v619_v9   ;;  %v621_v44 = vsub.f32 -inf, %v619_v9 }
 0x3fb   : > { %v622_v45 = vmul.f32 1.442695, %v621_v44 }
 0x3fc   : > { %v545_v5 = vpop.permute.xlu0 %544 }
 0x3fd   : > { %640 = vrot.lane.b32.xlu1 %v1264_v18, %s1176_s4 }
 0x421   : > { %764 = vmax.xlane.f32.xlu1 %v763_v11 }
 0x474   : > { %v627_v12 = vpop.permute.xlu1 %626 }
 0x475   : > { %v629_v13 = vsub.f32 %v608_v57, %v627_v12 }
 0x477   : > { %v630_v14 = vmul.f32 1.442695, %v629_v13 }
 0x478   : > { %v641_v15 = vpop.permute.xlu1 %640 }
 0x479   : > { %1126 = vpow2.f32 %v630_v14  ;;  %v646_v16 = vsel %vm361_vm3, %v641_v15, 0  ;;  %v345_v15 = vmul.f32 0.0, %v1295_v37 }
 0x47a   : > { %1057 = vmatpush3.bf16.msra.mxu0 %v646_v16  ;;  %1128 = vpow2.f32 %v476_v22 }
 0x47b   : > { %1068 = vmatprep.subr.bf16.mxu0 %v1168_v0 }
 0x486   : > { %v1127_v19 = vpop.eup %1126 }
 0x487   : > { %v639_v21 = vpack.c.bf16 %v1127_v19, %v1127_v19  ;;  %v1129_v18 = vpop.eup %1128  ;;  %v633_v31 = vsel %vm281_vm1, %v1127_v19, 0.0 }
 0x488   : > { %v547_v23 = vmul.f32 %v1129_v18, %v545_v5  ;;  %v486_v58 = vmul.f32 0.0, %v1129_v18 }
 0x489   : > { %1059 = vmatmul.mubr.msk.bf16.vlgmr.msra.gmra.mxu0 %vm281_vm1, %v639_v21 }
 0x48a   : > { %1070 = vmatprep.mubr.msk.bf16.mxu0 %vm1169_vm0, %v1168_v0  ;;  %v346_v0 = vsel %vm281_vm1, %v1275_v25, 0.0 }
 0x49c   : > { %v536_v24 = vpop.f32.mrf.mxu0 }
 0x49d   : > { %v548_v26 = vadd.f32 %v547_v23, %v536_v24 }
 0x49e   : > { %v1048_v27 = vpop.f32.mrf.mxu0 }
 0x49f   : > { %550 = vrot.lane.b32.xlu1 %v548_v26, %s1177_s5 }
 0x4a0   : > { %v539_v28 = vpop.f32.mrf.mxu0 }
 0x4a2   : > { %v1049_v29 = vpop.f32.mrf.mxu0 }
 0x4aa   : > { %v765_v30 = vpop.xlane.xlu1 %764 }
 0x4ab   : > { %772 = vperm.xlu0 %1111, %v765_v30   ;;  %v767_v3 = vsub.f32 -inf, %v765_v30 }
 0x4ad   : > { %v768_v4 = vmul.f32 1.442695, %v767_v3 }
 0x4af   : > { %786 = vrot.lane.b32.xlu0 %v1271_v20, %s1178_s6 }
 0x4c3   : > { %634 = vadd.xlane.f32.xlu1 %v633_v31 }
 0x4c7   : > { %347 = vadd.xlane.f32.xlu1 %v346_v0 }
 0x511   : > { %v551_v32 = vpop.permute.xlu1 %550 }
 0x512   : > { %554 = vst.msk [vmem:[#allocation4] sm:$0xff] %vm553_vm4, %v551_v32 }
 0x519   : > { %v688_v33 = vld [vmem:[#allocation4] sm:$0xff] }
 0x51a   : > { %690 = vrot.lane.b32.xlu0 %v688_v33, %s1173_s28 }
 0x526   : > { %v773_v34 = vpop.permute.xlu0 %772 }
 0x527   : > { %v775_v35 = vsub.f32 %v754_v10, %v773_v34 }
 0x529   : > { %v776_v36 = vmul.f32 1.442695, %v775_v35 }
 0x52a   : > { %v787_v38 = vpop.permute.xlu0 %786 }
 0x52b   : > { %1130 = vpow2.f32 %v776_v36  ;;  %v792_v20 = vsel %vm361_vm3, %v787_v38, 0 }
 0x52c   : > { %1069 = vmatpush3.bf16.msra.mxu0 %v792_v20  ;;  %1132 = vpow2.f32 %v622_v45 }
 0x538   : > { %v1131_v39 = vpop.eup %1130 }
 0x539   : > { %v785_v40 = vpack.c.bf16 %v1131_v39, %v1131_v39  ;;  %v1133_v46 = vpop.eup %1132  ;;  %v779_v51 = vsel %vm281_vm1, %v1131_v39, 0.0 }
 0x53a   : > { %v632_v61 = vmul.f32 0.0, %v1133_v46 }
 0x53b   : > { %1071 = vmatmul.mubr.msk.bf16.vlgmr.msra.gmra.mxu0 %vm281_vm1, %v785_v40 }
 0x549   : > { %v682_v25 = vpop.f32.mrf.mxu0 }
 0x54b   : > { %v1060_v41 = vpop.f32.mrf.mxu0 }
 0x54c   : > { %v635_v59 = vpop.xlane.xlu1 %634 }
 0x54d   : > { %v685_v42 = vpop.f32.mrf.mxu0  ;;  %v636_v63 = vadd.f32 %v635_v59, %v632_v61 }
 0x54f   : > { %v1061_v43 = vpop.f32.mrf.mxu0 }
 0x550   : > { %v348_v14 = vpop.xlane.xlu1 %347 }
 0x551   : > { %v349_v16 = vadd.f32 %v348_v14, %v345_v15 }
 0x58c   : > { %v691_v47 = vpop.permute.xlu0 %690 }
 0x58d   : > { %v693_v48 = vmul.f32 %v1133_v46, %v691_v47 }
 0x58f   : > { %v694_v49 = vadd.f32 %v693_v48, %v682_v25 }
 0x591   : > { %696 = vrot.lane.b32.xlu0 %v694_v49, %s1179_s7 }
 0x5b0   : > { %488 = vadd.xlane.f32.xlu0 %v487_v50 }
 0x5b4   : > { %780 = vadd.xlane.f32.xlu0 %v779_v51 }
 0x5fb   : > { %v828_v52 = vpop.f32.mrf.mxu0 }
 0x5fd   : > { %v1072_v53 = vpop.f32.mrf.mxu0 }
 0x5ff   : > { %v831_v54 = vpop.f32.mrf.mxu0 }
 0x601   : > { %v1073_v55 = vpop.f32.mrf.mxu0 }
 0x603   : > { %v697_v56 = vpop.permute.xlu0 %696 }
 0x604   : > { %700 = vst.msk [vmem:[#allocation4] sm:$0xff] %vm699_vm5, %v697_v56 }
 0x60b   : > { %v834_v57 = vld [vmem:[#allocation4] sm:$0xff] }
 0x60c   : > { %836 = vrot.lane.b32.xlu0 %v834_v57, %s1174_s29 }
 0x639   : > { %v489_v60 = vpop.xlane.xlu0 %488 }
 0x63a   : > { %v490_v62 = vadd.f32 %v489_v60, %v486_v58 }
 0x63c   : > { %1134 = vrcp.f32 %v490_v62 }
 0x63d   : > { %1136 = vrcp.f32 %v636_v63  ;;  %v781_v7 = vpop.xlane.xlu0 %780 }
 0x63e   : > { %1138 = vpow2.f32 %v768_v4 }
 0x649   : > { %v1135_v1 = vpop.eup %1134 }
 0x64a   : > { %859 = vrot.lane.b32.xlu0 %v1135_v1, %s1177_s5  ;;  %v1137_v2 = vpop.eup %1136 }
 0x64b   : > { %v1139_v6 = vpop.eup %1138 }
 0x64c   : > { %v778_v8 = vmul.f32 0.0, %v1139_v6 }
 0x64e   : > { %863 = vrot.lane.b32.xlu0 %v1137_v2, %s1179_s7  ;;  %v782_v9 = vadd.f32 %v781_v7, %v778_v8 }
 0x650   : > { %1140 = vrcp.f32 %v782_v9 }
 0x651   : > { %1142 = vrcp.f32 %v349_v16 }
 0x65d   : > { %v1141_v13 = vpop.eup %1140 }
 0x65e   : > { %v1143_v22 = vpop.eup %1142 }
 0x67e   : > { %v837_v10 = vpop.permute.xlu0 %836 }
 0x67f   : > { %v839_v11 = vmul.f32 %v1139_v6, %v837_v10 }
 0x681   : > { %v840_v12 = vadd.f32 %v839_v11, %v828_v52 }
 0x683   : > { %842 = vrot.lane.b32.xlu1 %v840_v12, %s1180_s8 }
 0x687   : > { %867 = vrot.lane.b32.xlu1 %v1141_v13, %s1180_s8 }
 0x6bc   : > { %v860_v17 = vpop.permute.xlu0 %859 }
 0x6bd   : > { %v870_v18 = vsel %vm281_vm1, %v1143_v22, %v860_v17 }
 0x6c0   : > { %v864_v21 = vpop.permute.xlu0 %863 }
 0x6c1   : > { %v872_v23 = vsel %vm871_vm7, %v870_v18, %v864_v21 }
 0x6f5   : > { %v843_v19 = vpop.permute.xlu1 %842 }
 0x6f6   : > { %846 = vst.msk [vmem:[#allocation4] sm:$0xff] %vm845_vm6, %v843_v19 }
 0x6f9   : > { %v868_v5 = vpop.permute.xlu1 %867 }
 0x6fa   : > { %v874_v26 = vsel %vm873_vm8, %v872_v23, %v868_v5 }
 0x6fd   : > { %v875_v24 = vld [vmem:[#allocation4] sm:$0xff] }
 0x6fe   : > { %v876_v27 = vmul.f32 %v875_v24, %v874_v26 }
 0x700   : > { %v877_v37 = vpack.c.bf16 %v876_v27, %v876_v27 }
 0x702   : > { %879 = vst.msk [vmem:[%s256_s11] sm:$0xf] %vm878_vm9, %v877_v37 }
 0x703 PF: > { %s13_s14 = sadd.s32 1, %s1166_s14   ;;  %s1355_s12 = smov %s1162_s13 }
 0x704   : > { %p10_p5 = scmp.ge.s32.totalorder %s13_s14, 4   ;;  %s1356_s13 = smov %s1358_s15 }
 0x706   :  { %12 = sbr.rel (!%p10_p5) target bundleno = 2 (0x2), region = 82 }

</bundles_post_ra>
